<compile_context>
chip_gen: v6e
topology: v6e:2x2x1
jax: 0.10.0
libtpu: 0.0.40
codegen_flags: <defaults>
</compile_context>

<pallas_src>
import functools

import jax
import jax.numpy as jnp
from jax import lax
from jax.experimental import pallas as pl
from jax.experimental.pallas import tpu as pltpu


_VMEM_LIMIT_BYTES = 48 * 1024 * 1024   # within v7x 64 MiB/TC; fine on v5e/v6e
_VMEM_BUDGET_BYTES = 36 * 1024 * 1024  # headroom for Mosaic internals


def _round_up(n, m):
    return ((n + m - 1) // m) * m


def _sigmoid(a):
    # sigmoid via tanh: one EUP push per element instead of exp + divide.
    return 0.5 * (jnp.tanh(0.5 * a) + 1.0)


def _gru_rec_kernel(x_ref, wih_ref, gib_ref, whh_ref, bhn_ref,
                    out_ref, h_ref, gi_ref, *,
                    seq_len, needs_mask, unroll, carry_in_vregs):
    """One bidirectional-GRU layer. Grid = (direction, time_chunk).

    x_ref  : (Tt, B, D)    input chunk (true time order)
    wih_ref: (D, 3H)       input weights (transposed), gate order [r|z|n]
    gib_ref: (1, 3H)       b_ih with b_hr/b_hz folded in
    whh_ref: (H, 3H)       recurrent weights (transposed)
    bhn_ref: (1, H)        hidden bias of the n gate (cannot be pre-folded)
    out_ref: (Tt, B, H)    per-step hidden states for this chunk
    h_ref  : (B, H) f32    recurrent carry, persists across time chunks
    gi_ref : (Tt, B, 3H)   VMEM scratch for the chunk's input projection
    """
    d = pl.program_id(0)                 # 0 = forward, 1 = backward
    c = pl.program_id(1)                 # chunk index in processing order
    n_chunks = pl.num_programs(1)
    Tt, B, H = out_ref.shape
    D = x_ref.shape[-1]
    H3 = 3 * H

    @pl.when(c == 0)
    def _():
        h_ref[...] = jnp.zeros_like(h_ref)

    # ---- fused input projection for the whole chunk: one big MXU matmul ----
    # (no HBM round-trip of a (2,T,B,3H) gi tensor).  B is a multiple of 8 so
    # the (Tt,B,D)->(Tt*B,D) collapse is layout-free.
    x2d = x_ref[...].reshape(Tt * B, D)
    gi2d = jnp.dot(x2d, wih_ref[...], preferred_element_type=jnp.float32)
    gi_ref[...] = (gi2d + gib_ref[...]).reshape(Tt, B, H3)

    # Hoist loop-invariant broadcast out of the serial recurrence.
    bhn = jnp.broadcast_to(bhn_ref[...], (B, H))

    # Actual time-chunk index (backward walks chunks in reverse order).
    c_time = (1 - d) * c + d * (n_chunks - 1 - c)

    def cell(s, h):
        # Backward direction walks the chunk in reverse local time order.
        t = (1 - d) * s + d * (Tt - 1 - s)
        gi = gi_ref[t]                                        # (B, 3H) f32
        # Load W_hh from VMEM each step (no vreg-resident hoist -> no spills).
        gh = jnp.dot(h, whh_ref[...], preferred_element_type=jnp.float32)
        r = _sigmoid(gi[:, :H] + gh[:, :H])
        z = _sigmoid(gi[:, H:2 * H] + gh[:, H:2 * H])
        n = jnp.tanh(gi[:, 2 * H:] + r * (gh[:, 2 * H:] + bhn))
        h_new = (1.0 - z) * n + z * h
        if needs_mask:
            # Padded tail timesteps must not disturb the recurrent carry
            # (matters for the backward direction, which meets them first).
            h_new = jnp.where(c_time * Tt + t < seq_len, h_new, h)
        out_ref[t] = h_new.astype(out_ref.dtype)
        return h_new

    if carry_in_vregs:
        # h stays in vregs across the chunk: one VMEM read + one write total.
        h_ref[...] = lax.fori_loop(0, Tt, cell, h_ref[...], unroll=unroll)
    else:
        def step(s, carry):
            h_ref[...] = cell(s, h_ref[...])
            return carry
        lax.fori_loop(0, Tt, step, 0, unroll=unroll)


def _pick_time_chunk(T, Bp, D, Hp, budget=_VMEM_BUDGET_BYTES, max_tt=512):
    """VMEM-aware chunk size: double-buffered x & out streams + gi scratch
    + weights + h carry must fit in the scoped-VMEM budget."""
    f32 = 4
    H3p = 3 * Hp
    fixed = (2 * D * H3p          # W_ih (double-buffered)
             + 2 * Hp * H3p       # W_hh (double-buffered)
             + 2 * (H3p + Hp)     # biases
             + Bp * Hp) * f32     # h carry scratch
    per_t = Bp * f32 * (2 * D + 2 * Hp + H3p)   # x db + out db + gi scratch
    tt = (budget - fixed) // max(per_t, 1)
    return int(max(1, min(max_tt, T, tt)))


def _prep_direction(p, D, H, Hp):
    """Transpose / gate-pad one direction's params to lane-aligned layout."""
    w_ih, w_hh, b_ih, b_hh = p            # (3H,D), (3H,H), (3H,), (3H,)
    H3p = 3 * Hp
    wih_t = jnp.zeros((D, H3p), jnp.float32)
    whh_t = jnp.zeros((Hp, H3p), jnp.float32)
    gib = jnp.zeros((1, H3p), jnp.float32)
    bhn = jnp.zeros((1, Hp), jnp.float32)
    for g in range(3):                    # gate blocks r, z, n at offsets g*Hp
        wih_t = wih_t.at[:, g * Hp:g * Hp + H].set(w_ih[g * H:(g + 1) * H, :].T)
        whh_t = whh_t.at[:H, g * Hp:g * Hp + H].set(w_hh[g * H:(g + 1) * H, :].T)
        seg = b_ih[g * H:(g + 1) * H]
        if g < 2:                         # fold b_hr / b_hz into gi bias
            seg = seg + b_hh[g * H:(g + 1) * H]
        gib = gib.at[0, g * Hp:g * Hp + H].set(seg)
    bhn = bhn.at[0, :H].set(b_hh[2 * H:])
    return wih_t, whh_t, gib, bhn


def gru_bi_layer(x_tbd, fwd_p, bwd_p):
    """One bidirectional GRU layer, time-major in/out: (T,B,D) -> (T,B,2H)."""
    T, B, D = x_tbd.shape
    H = fwd_p[1].shape[1]                 # w_hh is (3H, H)
    Hp = _round_up(H, 128)                # lane-aligned per-direction hidden
    Bp = _round_up(B, 8)                  # sublane-aligned batch
    H3p = 3 * Hp

    wih_f, whh_f, gib_f, bhn_f = _prep_direction(fwd_p, D, H, Hp)
    wih_b, whh_b, gib_b, bhn_b = _prep_direction(bwd_p, D, H, Hp)
    wih_s = jnp.stack([wih_f, wih_b])     # (2, D, 3Hp)
    whh_s = jnp.stack([whh_f, whh_b])     # (2, Hp, 3Hp)
    gib_s = jnp.stack([gib_f, gib_b])     # (2, 1, 3Hp)
    bhn_s = jnp.stack([bhn_f, bhn_b])     # (2, 1, Hp)

    Tt = _pick_time_chunk(T, Bp, D, Hp)
    Tp = _round_up(T, Tt)
    C = Tp // Tt

    # Zero-pad batch / time once per layer; padded h columns provably stay 0.
    x_p = jnp.zeros((Tp, Bp, D), jnp.float32).at[:T, :B, :].set(x_tbd)

    def tmap(d, c):
        # Forward streams chunks 0..C-1; backward streams them in reverse.
        return (1 - d) * c + d * (C - 1 - c)

    kernel = functools.partial(
        _gru_rec_kernel,
        seq_len=T,
        needs_mask=(Tp != T),
        unroll=min(Tt, 8),
        carry_in_vregs=(Bp * Hp * 4 <= 16 * 4096),   # keep carry in vregs if small
    )

    out = pl.pallas_call(
        kernel,
        out_shape=jax.ShapeDtypeStruct((2, Tp, Bp, Hp), jnp.float32),
        grid=(2, C),
        in_specs=[
            pl.BlockSpec((Tt, Bp, D), lambda d, c: (tmap(d, c), 0, 0)),
            pl.BlockSpec((None, D, H3p), lambda d, c: (d, 0, 0)),
            pl.BlockSpec((None, 1, H3p), lambda d, c: (d, 0, 0)),
            pl.BlockSpec((None, Hp, H3p), lambda d, c: (d, 0, 0)),
            pl.BlockSpec((None, 1, Hp), lambda d, c: (d, 0, 0)),
        ],
        out_specs=pl.BlockSpec((None, Tt, Bp, Hp),
                               lambda d, c: (d, tmap(d, c), 0, 0)),
        scratch_shapes=[
            pltpu.VMEM((Bp, Hp), jnp.float32),        # recurrent carry h
            pltpu.VMEM((Tt, Bp, H3p), jnp.float32),   # per-chunk gi
        ],
        compiler_params=pltpu.CompilerParams(
            dimension_semantics=("parallel", "arbitrary"),
            vmem_limit_bytes=_VMEM_LIMIT_BYTES),
    )(x_p, wih_s, gib_s, whh_s, bhn_s)

    # Backward outputs were written at their true time indices in-kernel;
    # just strip padding and concat the feature dims.
    return jnp.concatenate([out[0, :T, :B, :H], out[1, :T, :B, :H]], axis=-1)


def gru_bi_forward(x, params):
    """GRU_bi forward: x (B, T, input_size) -> (B, T, hidden_size)."""
    h = jnp.swapaxes(x, 0, 1)             # single transpose to time-major
    for fwd_p, bwd_p in params:
        h = gru_bi_layer(h, fwd_p, bwd_p)
    return jnp.swapaxes(h, 0, 1)           # back to batch_first once at the end


def init_gru_bi_params(key, input_size, hidden_size, num_layers):
    """Deterministic params matching PyTorch GRU shapes (U(-1/sqrt(H), 1/sqrt(H)))."""
    H = hidden_size // 2                   # per-direction hidden
    bound = 1.0 / jnp.sqrt(jnp.float32(H))
    params = []
    for layer in range(num_layers):
        d_in = input_size if layer == 0 else hidden_size   # 2*H feeds later layers
        layer_params = []
        for _direction in range(2):
            key, k1, k2, k3, k4 = jax.random.split(key, 5)
            w_ih = jax.random.uniform(k1, (3 * H, d_in), jnp.float32, -bound, bound)
            w_hh = jax.random.uniform(k2, (3 * H, H), jnp.float32, -bound, bound)
            b_ih = jax.random.uniform(k3, (3 * H,), jnp.float32, -bound, bound)
            b_hh = jax.random.uniform(k4, (3 * H,), jnp.float32, -bound, bound)
            layer_params.append((w_ih, w_hh, b_ih, b_hh))
        params.append(tuple(layer_params))
    return params


# --- pure-JAX reference (correctness check) ----------------------------------
def _gru_dir_ref(x, w_ih, w_hh, b_ih, b_hh):
    H = w_hh.shape[1]
    hp = lax.Precision.HIGHEST

    def step(h, x_t):
        gi = jnp.dot(x_t, w_ih.T, precision=hp) + b_ih
        gh = jnp.dot(h, w_hh.T, precision=hp) + b_hh
        r = jax.nn.sigmoid(gi[:, :H] + gh[:, :H])
        z = jax.nn.sigmoid(gi[:, H:2 * H] + gh[:, H:2 * H])
        n = jnp.tanh(gi[:, 2 * H:] + r * gh[:, 2 * H:])
        h_new = (1.0 - z) * n + z * h
        return h_new, h_new

    h0 = jnp.zeros((x.shape[0], H), jnp.float32)
    _, ys = lax.scan(step, h0, jnp.swapaxes(x, 0, 1))
    return jnp.swapaxes(ys, 0, 1)


def _gru_bi_ref(x, params):
    out = x
    for fwd_p, bwd_p in params:
        y_f = _gru_dir_ref(out, *fwd_p)
        y_b = _gru_dir_ref(out[:, ::-1, :], *bwd_p)[:, ::-1, :]
        out = jnp.concatenate([y_f, y_b], axis=-1)
    return out


if __name__ == "__main__":
    # Small shapes consistent with the module: batch=2, seq=8, input_size=16,
    # hidden_size=32 (=> 16 per direction), num_layers=2.
    B, T = 2, 8
    input_size, hidden_size, num_layers = 16, 32, 2

    key = jax.random.PRNGKey(0)
    key, kx, kp = jax.random.split(key, 3)
    x = jax.random.normal(kx, (B, T, input_size), jnp.float32)
    params = init_gru_bi_params(kp, input_size, hidden_size, num_layers)

    out = jax.block_until_ready(gru_bi_forward(x, params))
    assert out.shape == (B, T, hidden_size), out.shape

    ref = jax.block_until_ready(_gru_bi_ref(x, params))
    assert jnp.allclose(out, ref, atol=1e-3, rtol=1e-3), (
        float(jnp.max(jnp.abs(out - ref))))

    print("KERNEL_OK")
</pallas_src>

<mosaic_0001>
module attributes {stable_mosaic.version = 11 : i64} {
  func.func @_gru_rec_kernel(%arg0: i32, %arg1: i32, %arg2: memref<8x8x16xf32, #tpu.memory_space<vmem>>, %arg3: memref<1x16x384xf32, #tpu.memory_space<vmem>>, %arg4: memref<1x1x384xf32, #tpu.memory_space<vmem>>, %arg5: memref<1x128x384xf32, #tpu.memory_space<vmem>>, %arg6: memref<1x1x128xf32, #tpu.memory_space<vmem>>, %arg7: memref<1x8x8x128xf32, #tpu.memory_space<vmem>>, %arg8: memref<8x128xf32, #tpu.memory_space<vmem>>, %arg9: memref<8x8x384xf32, #tpu.memory_space<vmem>>) attributes {dimension_semantics = [#tpu.dimension_semantics<parallel>, #tpu.dimension_semantics<arbitrary>], iteration_bounds = array<i64: 2, 1>, scalar_prefetch = 0 : i64, scratch_operands = 2 : i64, tpu.core_type = #tpu.core_type<tc>, window_params = [{transform_indices = @transform_0, window_bounds = array<i64: 8, 8, 16>}, {transform_indices = @transform_1, window_bounds = array<i64: 1, 16, 384>}, {transform_indices = @transform_2, window_bounds = array<i64: 1, 1, 384>}, {transform_indices = @transform_3, window_bounds = array<i64: 1, 128, 384>}, {transform_indices = @transform_4, window_bounds = array<i64: 1, 1, 128>}, {transform_indices = @transform_5, window_bounds = array<i64: 1, 8, 8, 128>}]} {
    %c0_i32 = arith.constant 0 : i32
    %0 = arith.cmpi eq, %arg1, %c0_i32 : i32
    %1 = arith.extui %0 : i1 to i32
    %c0_i32_0 = arith.constant 0 : i32
    %2 = arith.cmpi ne, %1, %c0_i32_0 : i32
    scf.if %2 {
      %cst_164 = arith.constant 0.000000e+00 : f32
      %388 = vector.broadcast %cst_164 : f32 to vector<8x128xf32>
      %c0_165 = arith.constant 0 : index
      %c0_166 = arith.constant 0 : index
      %389 = vector.load %arg8[%c0_165, %c0_166] : memref<8x128xf32, #tpu.memory_space<vmem>>, vector<8x128xf32>
      tpu.vector_store %arg8[%c0_165, %c0_166], %388 {strides = array<i32>} : memref<8x128xf32, #tpu.memory_space<vmem>>, vector<8x128xf32>,
    } else {
    }
    %c0 = arith.constant 0 : index
    %c0_1 = arith.constant 0 : index
    %c0_2 = arith.constant 0 : index
    %3 = vector.load %arg2[%c0, %c0_1, %c0_2] : memref<8x8x16xf32, #tpu.memory_space<vmem>>, vector<8x8x16xf32>
    %4 = vector.shape_cast %3 : vector<8x8x16xf32> to vector<64x16xf32>
    %c0_3 = arith.constant 0 : index
    %c0_4 = arith.constant 0 : index
    %c0_5 = arith.constant 0 : index
    %5 = vector.load %arg3[%c0_3, %c0_4, %c0_5] : memref<1x16x384xf32, #tpu.memory_space<vmem>>, vector<1x16x384xf32>
    %6 = vector.shape_cast %5 : vector<1x16x384xf32> to vector<16x384xf32>
    %cst = arith.constant dense<0.000000e+00> : vector<64x384xf32>
    %7 = tpu.matmul %4, %6, %cst {dimension_numbers = #tpu.dot_dimension_numbers<[1], [0], [0], [1], [0, 0, 1, 1], [], []>} : vector<64x16xf32>, vector<16x384xf32>, vector<64x384xf32> -> vector<64x384xf32>
    %c0_6 = arith.constant 0 : index
    %c0_7 = arith.constant 0 : index
    %c0_8 = arith.constant 0 : index
    %8 = vector.load %arg4[%c0_6, %c0_7, %c0_8] : memref<1x1x384xf32, #tpu.memory_space<vmem>>, vector<1x1x384xf32>
    %9 = vector.shape_cast %8 : vector<1x1x384xf32> to vector<1x384xf32>
    %10 = vector.broadcast %9 : vector<1x384xf32> to vector<64x384xf32>
    %11 = arith.addf %7, %10 : vector<64x384xf32>
    %12 = vector.shape_cast %11 : vector<64x384xf32> to vector<8x8x384xf32>
    %c0_9 = arith.constant 0 : index
    %c0_10 = arith.constant 0 : index
    %c0_11 = arith.constant 0 : index
    %13 = vector.load %arg9[%c0_9, %c0_10, %c0_11] : memref<8x8x384xf32, #tpu.memory_space<vmem>>, vector<8x8x384xf32>
    tpu.vector_store %arg9[%c0_9, %c0_10, %c0_11], %12 {strides = array<i32>} : memref<8x8x384xf32, #tpu.memory_space<vmem>>, vector<8x8x384xf32>,
    %c0_12 = arith.constant 0 : index
    %c0_13 = arith.constant 0 : index
    %c0_14 = arith.constant 0 : index
    %14 = vector.load %arg6[%c0_12, %c0_13, %c0_14] : memref<1x1x128xf32, #tpu.memory_space<vmem>>, vector<1x1x128xf32>
    %15 = vector.shape_cast %14 : vector<1x1x128xf32> to vector<1x128xf32>
    %16 = vector.shape_cast %15 : vector<1x128xf32> to vector<1x128xf32>
    %17 = vector.broadcast %16 : vector<1x128xf32> to vector<8x128xf32>
    %c0_15 = arith.constant 0 : index
    %c0_16 = arith.constant 0 : index
    %18 = vector.load %arg8[%c0_15, %c0_16] : memref<8x128xf32, #tpu.memory_space<vmem>>, vector<8x128xf32>
    %c0_i32_17 = arith.constant 0 : i32
    %c1_i32 = arith.constant 1 : i32
    %19 = arith.subi %c1_i32, %arg0 : i32
    %20 = arith.muli %19, %c0_i32_17 : i32
    %c7_i32 = arith.constant 7 : i32
    %21 = arith.subi %c7_i32, %c0_i32_17 : i32
    %22 = arith.muli %arg0, %21 : i32
    %23 = arith.addi %20, %22 : i32
    %24 = arith.index_cast %23 : i32 to index
    %c0_18 = arith.constant 0 : index
    %c0_19 = arith.constant 0 : index
    %25 = vector.load %arg9[%24, %c0_18, %c0_19] : memref<8x8x384xf32, #tpu.memory_space<vmem>>, vector<1x8x384xf32>
    %26 = vector.shape_cast %25 : vector<1x8x384xf32> to vector<8x384xf32>
    %c0_20 = arith.constant 0 : index
    %c0_21 = arith.constant 0 : index
    %c0_22 = arith.constant 0 : index
    %27 = vector.load %arg5[%c0_20, %c0_21, %c0_22] : memref<1x128x384xf32, #tpu.memory_space<vmem>>, vector<1x128x384xf32>
    %28 = vector.shape_cast %27 : vector<1x128x384xf32> to vector<128x384xf32>
    %cst_23 = arith.constant dense<0.000000e+00> : vector<8x384xf32>
    %29 = tpu.matmul %18, %28, %cst_23 {dimension_numbers = #tpu.dot_dimension_numbers<[1], [0], [0], [1], [0, 0, 1, 1], [], []>} : vector<8x128xf32>, vector<128x384xf32>, vector<8x384xf32> -> vector<8x384xf32>
    %30 = vector.extract_strided_slice %26 {offsets = [0, 0], sizes = [8, 128], strides = [1, 1]} : vector<8x384xf32> to vector<8x128xf32>
    %31 = vector.extract_strided_slice %29 {offsets = [0, 0], sizes = [8, 128], strides = [1, 1]} : vector<8x384xf32> to vector<8x128xf32>
    %32 = arith.addf %30, %31 : vector<8x128xf32>
    %cst_24 = arith.constant 5.000000e-01 : f32
    %33 = vector.broadcast %cst_24 : f32 to vector<8x128xf32>
    %34 = arith.mulf %33, %32 : vector<8x128xf32>
    %35 = math.tanh %34 : vector<8x128xf32>
    %cst_25 = arith.constant 1.000000e+00 : f32
    %36 = vector.broadcast %cst_25 : f32 to vector<8x128xf32>
    %37 = arith.addf %35, %36 : vector<8x128xf32>
    %cst_26 = arith.constant 5.000000e-01 : f32
    %38 = vector.broadcast %cst_26 : f32 to vector<8x128xf32>
    %39 = arith.mulf %38, %37 : vector<8x128xf32>
    %40 = vector.extract_strided_slice %26 {offsets = [0, 128], sizes = [8, 128], strides = [1, 1]} : vector<8x384xf32> to vector<8x128xf32>
    %41 = vector.extract_strided_slice %29 {offsets = [0, 128], sizes = [8, 128], strides = [1, 1]} : vector<8x384xf32> to vector<8x128xf32>
    %42 = arith.addf %40, %41 : vector<8x128xf32>
    %cst_27 = arith.constant 5.000000e-01 : f32
    %43 = vector.broadcast %cst_27 : f32 to vector<8x128xf32>
    %44 = arith.mulf %43, %42 : vector<8x128xf32>
    %45 = math.tanh %44 : vector<8x128xf32>
    %cst_28 = arith.constant 1.000000e+00 : f32
    %46 = vector.broadcast %cst_28 : f32 to vector<8x128xf32>
    %47 = arith.addf %45, %46 : vector<8x128xf32>
    %cst_29 = arith.constant 5.000000e-01 : f32
    %48 = vector.broadcast %cst_29 : f32 to vector<8x128xf32>
    %49 = arith.mulf %48, %47 : vector<8x128xf32>
    %50 = vector.extract_strided_slice %26 {offsets = [0, 256], sizes = [8, 128], strides = [1, 1]} : vector<8x384xf32> to vector<8x128xf32>
    %51 = vector.extract_strided_slice %29 {offsets = [0, 256], sizes = [8, 128], strides = [1, 1]} : vector<8x384xf32> to vector<8x128xf32>
    %52 = arith.addf %51, %17 : vector<8x128xf32>
    %53 = arith.mulf %39, %52 : vector<8x128xf32>
    %54 = arith.addf %50, %53 : vector<8x128xf32>
    %55 = math.tanh %54 : vector<8x128xf32>
    %cst_30 = arith.constant 1.000000e+00 : f32
    %56 = vector.broadcast %cst_30 : f32 to vector<8x128xf32>
    %57 = arith.subf %56, %49 : vector<8x128xf32>
    %58 = arith.mulf %57, %55 : vector<8x128xf32>
    %59 = arith.mulf %49, %18 : vector<8x128xf32>
    %60 = arith.addf %58, %59 : vector<8x128xf32>
    %c0_31 = arith.constant 0 : index
    %61 = arith.index_cast %23 : i32 to index
    %c0_32 = arith.constant 0 : index
    %c0_33 = arith.constant 0 : index
    %62 = vector.load %arg7[%c0_31, %61, %c0_32, %c0_33] : memref<1x8x8x128xf32, #tpu.memory_space<vmem>>, vector<1x1x8x128xf32>
    %63 = vector.shape_cast %62 : vector<1x1x8x128xf32> to vector<8x128xf32>
    %64 = vector.shape_cast %60 : vector<8x128xf32> to vector<1x1x8x128xf32>
    tpu.vector_store %arg7[%c0_31, %61, %c0_32, %c0_33], %64 {strides = array<i32>} : memref<1x8x8x128xf32, #tpu.memory_space<vmem>>, vector<1x1x8x128xf32>,
    %c1_i32_34 = arith.constant 1 : i32
    %c1_i32_35 = arith.constant 1 : i32
    %65 = arith.subi %c1_i32_35, %arg0 : i32
    %66 = arith.muli %65, %c1_i32_34 : i32
    %c7_i32_36 = arith.constant 7 : i32
    %67 = arith.subi %c7_i32_36, %c1_i32_34 : i32
    %68 = arith.muli %arg0, %67 : i32
    %69 = arith.addi %66, %68 : i32
    %70 = arith.index_cast %69 : i32 to index
    %c0_37 = arith.constant 0 : index
    %c0_38 = arith.constant 0 : index
    %71 = vector.load %arg9[%70, %c0_37, %c0_38] : memref<8x8x384xf32, #tpu.memory_space<vmem>>, vector<1x8x384xf32>
    %72 = vector.shape_cast %71 : vector<1x8x384xf32> to vector<8x384xf32>
    %c0_39 = arith.constant 0 : index
    %c0_40 = arith.constant 0 : index
    %c0_41 = arith.constant 0 : index
    %73 = vector.load %arg5[%c0_39, %c0_40, %c0_41] : memref<1x128x384xf32, #tpu.memory_space<vmem>>, vector<1x128x384xf32>
    %74 = vector.shape_cast %73 : vector<1x128x384xf32> to vector<128x384xf32>
    %cst_42 = arith.constant dense<0.000000e+00> : vector<8x384xf32>
    %75 = tpu.matmul %60, %74, %cst_42 {dimension_numbers = #tpu.dot_dimension_numbers<[1], [0], [0], [1], [0, 0, 1, 1], [], []>} : vector<8x128xf32>, vector<128x384xf32>, vector<8x384xf32> -> vector<8x384xf32>
    %76 = vector.extract_strided_slice %72 {offsets = [0, 0], sizes = [8, 128], strides = [1, 1]} : vector<8x384xf32> to vector<8x128xf32>
    %77 = vector.extract_strided_slice %75 {offsets = [0, 0], sizes = [8, 128], strides = [1, 1]} : vector<8x384xf32> to vector<8x128xf32>
    %78 = arith.addf %76, %77 : vector<8x128xf32>
    %cst_43 = arith.constant 5.000000e-01 : f32
    %79 = vector.broadcast %cst_43 : f32 to vector<8x128xf32>
    %80 = arith.mulf %79, %78 : vector<8x128xf32>
    %81 = math.tanh %80 : vector<8x128xf32>
    %cst_44 = arith.constant 1.000000e+00 : f32
    %82 = vector.broadcast %cst_44 : f32 to vector<8x128xf32>
    %83 = arith.addf %81, %82 : vector<8x128xf32>
    %cst_45 = arith.constant 5.000000e-01 : f32
    %84 = vector.broadcast %cst_45 : f32 to vector<8x128xf32>
    %85 = arith.mulf %84, %83 : vector<8x128xf32>
    %86 = vector.extract_strided_slice %72 {offsets = [0, 128], sizes = [8, 128], strides = [1, 1]} : vector<8x384xf32> to vector<8x128xf32>
    %87 = vector.extract_strided_slice %75 {offsets = [0, 128], sizes = [8, 128], strides = [1, 1]} : vector<8x384xf32> to vector<8x128xf32>
    %88 = arith.addf %86, %87 : vector<8x128xf32>
    %cst_46 = arith.constant 5.000000e-01 : f32
    %89 = vector.broadcast %cst_46 : f32 to vector<8x128xf32>
    %90 = arith.mulf %89, %88 : vector<8x128xf32>
    %91 = math.tanh %90 : vector<8x128xf32>
    %cst_47 = arith.constant 1.000000e+00 : f32
    %92 = vector.broadcast %cst_47 : f32 to vector<8x128xf32>
    %93 = arith.addf %91, %92 : vector<8x128xf32>
    %cst_48 = arith.constant 5.000000e-01 : f32
    %94 = vector.broadcast %cst_48 : f32 to vector<8x128xf32>
    %95 = arith.mulf %94, %93 : vector<8x128xf32>
    %96 = vector.extract_strided_slice %72 {offsets = [0, 256], sizes = [8, 128], strides = [1, 1]} : vector<8x384xf32> to vector<8x128xf32>
    %97 = vector.extract_strided_slice %75 {offsets = [0, 256], sizes = [8, 128], strides = [1, 1]} : vector<8x384xf32> to vector<8x128xf32>
    %98 = arith.addf %97, %17 : vector<8x128xf32>
    %99 = arith.mulf %85, %98 : vector<8x128xf32>
    %100 = arith.addf %96, %99 : vector<8x128xf32>
    %101 = math.tanh %100 : vector<8x128xf32>
    %cst_49 = arith.constant 1.000000e+00 : f32
    %102 = vector.broadcast %cst_49 : f32 to vector<8x128xf32>
    %103 = arith.subf %102, %95 : vector<8x128xf32>
    %104 = arith.mulf %103, %101 : vector<8x128xf32>
    %105 = arith.mulf %95, %60 : vector<8x128xf32>
    %106 = arith.addf %104, %105 : vector<8x128xf32>
    %c0_50 = arith.constant 0 : index
    %107 = arith.index_cast %69 : i32 to index
    %c0_51 = arith.constant 0 : index
    %c0_52 = arith.constant 0 : index
    %108 = vector.load %arg7[%c0_50, %107, %c0_51, %c0_52] : memref<1x8x8x128xf32, #tpu.memory_space<vmem>>, vector<1x1x8x128xf32>
    %109 = vector.shape_cast %108 : vector<1x1x8x128xf32> to vector<8x128xf32>
    %110 = vector.shape_cast %106 : vector<8x128xf32> to vector<1x1x8x128xf32>
    tpu.vector_store %arg7[%c0_50, %107, %c0_51, %c0_52], %110 {strides = array<i32>} : memref<1x8x8x128xf32, #tpu.memory_space<vmem>>, vector<1x1x8x128xf32>,
    %c2_i32 = arith.constant 2 : i32
    %c1_i32_53 = arith.constant 1 : i32
    %111 = arith.subi %c1_i32_53, %arg0 : i32
    %112 = arith.muli %111, %c2_i32 : i32
    %c7_i32_54 = arith.constant 7 : i32
    %113 = arith.subi %c7_i32_54, %c2_i32 : i32
    %114 = arith.muli %arg0, %113 : i32
    %115 = arith.addi %112, %114 : i32
    %116 = arith.index_cast %115 : i32 to index
    %c0_55 = arith.constant 0 : index
    %c0_56 = arith.constant 0 : index
    %117 = vector.load %arg9[%116, %c0_55, %c0_56] : memref<8x8x384xf32, #tpu.memory_space<vmem>>, vector<1x8x384xf32>
    %118 = vector.shape_cast %117 : vector<1x8x384xf32> to vector<8x384xf32>
    %c0_57 = arith.constant 0 : index
    %c0_58 = arith.constant 0 : index
    %c0_59 = arith.constant 0 : index
    %119 = vector.load %arg5[%c0_57, %c0_58, %c0_59] : memref<1x128x384xf32, #tpu.memory_space<vmem>>, vector<1x128x384xf32>
    %120 = vector.shape_cast %119 : vector<1x128x384xf32> to vector<128x384xf32>
    %cst_60 = arith.constant dense<0.000000e+00> : vector<8x384xf32>
    %121 = tpu.matmul %106, %120, %cst_60 {dimension_numbers = #tpu.dot_dimension_numbers<[1], [0], [0], [1], [0, 0, 1, 1], [], []>} : vector<8x128xf32>, vector<128x384xf32>, vector<8x384xf32> -> vector<8x384xf32>
    %122 = vector.extract_strided_slice %118 {offsets = [0, 0], sizes = [8, 128], strides = [1, 1]} : vector<8x384xf32> to vector<8x128xf32>
    %123 = vector.extract_strided_slice %121 {offsets = [0, 0], sizes = [8, 128], strides = [1, 1]} : vector<8x384xf32> to vector<8x128xf32>
    %124 = arith.addf %122, %123 : vector<8x128xf32>
    %cst_61 = arith.constant 5.000000e-01 : f32
    %125 = vector.broadcast %cst_61 : f32 to vector<8x128xf32>
    %126 = arith.mulf %125, %124 : vector<8x128xf32>
    %127 = math.tanh %126 : vector<8x128xf32>
    %cst_62 = arith.constant 1.000000e+00 : f32
    %128 = vector.broadcast %cst_62 : f32 to vector<8x128xf32>
    %129 = arith.addf %127, %128 : vector<8x128xf32>
    %cst_63 = arith.constant 5.000000e-01 : f32
    %130 = vector.broadcast %cst_63 : f32 to vector<8x128xf32>
    %131 = arith.mulf %130, %129 : vector<8x128xf32>
    %132 = vector.extract_strided_slice %118 {offsets = [0, 128], sizes = [8, 128], strides = [1, 1]} : vector<8x384xf32> to vector<8x128xf32>
    %133 = vector.extract_strided_slice %121 {offsets = [0, 128], sizes = [8, 128], strides = [1, 1]} : vector<8x384xf32> to vector<8x128xf32>
    %134 = arith.addf %132, %133 : vector<8x128xf32>
    %cst_64 = arith.constant 5.000000e-01 : f32
    %135 = vector.broadcast %cst_64 : f32 to vector<8x128xf32>
    %136 = arith.mulf %135, %134 : vector<8x128xf32>
    %137 = math.tanh %136 : vector<8x128xf32>
    %cst_65 = arith.constant 1.000000e+00 : f32
    %138 = vector.broadcast %cst_65 : f32 to vector<8x128xf32>
    %139 = arith.addf %137, %138 : vector<8x128xf32>
    %cst_66 = arith.constant 5.000000e-01 : f32
    %140 = vector.broadcast %cst_66 : f32 to vector<8x128xf32>
    %141 = arith.mulf %140, %139 : vector<8x128xf32>
    %142 = vector.extract_strided_slice %118 {offsets = [0, 256], sizes = [8, 128], strides = [1, 1]} : vector<8x384xf32> to vector<8x128xf32>
    %143 = vector.extract_strided_slice %121 {offsets = [0, 256], sizes = [8, 128], strides = [1, 1]} : vector<8x384xf32> to vector<8x128xf32>
    %144 = arith.addf %143, %17 : vector<8x128xf32>
    %145 = arith.mulf %131, %144 : vector<8x128xf32>
    %146 = arith.addf %142, %145 : vector<8x128xf32>
    %147 = math.tanh %146 : vector<8x128xf32>
    %cst_67 = arith.constant 1.000000e+00 : f32
    %148 = vector.broadcast %cst_67 : f32 to vector<8x128xf32>
    %149 = arith.subf %148, %141 : vector<8x128xf32>
    %150 = arith.mulf %149, %147 : vector<8x128xf32>
    %151 = arith.mulf %141, %106 : vector<8x128xf32>
    %152 = arith.addf %150, %151 : vector<8x128xf32>
    %c0_68 = arith.constant 0 : index
    %153 = arith.index_cast %115 : i32 to index
    %c0_69 = arith.constant 0 : index
    %c0_70 = arith.constant 0 : index
    %154 = vector.load %arg7[%c0_68, %153, %c0_69, %c0_70] : memref<1x8x8x128xf32, #tpu.memory_space<vmem>>, vector<1x1x8x128xf32>
    %155 = vector.shape_cast %154 : vector<1x1x8x128xf32> to vector<8x128xf32>
    %156 = vector.shape_cast %152 : vector<8x128xf32> to vector<1x1x8x128xf32>
    tpu.vector_store %arg7[%c0_68, %153, %c0_69, %c0_70], %156 {strides = array<i32>} : memref<1x8x8x128xf32, #tpu.memory_space<vmem>>, vector<1x1x8x128xf32>,
    %c3_i32 = arith.constant 3 : i32
    %c1_i32_71 = arith.constant 1 : i32
    %157 = arith.subi %c1_i32_71, %arg0 : i32
    %158 = arith.muli %157, %c3_i32 : i32
    %c7_i32_72 = arith.constant 7 : i32
    %159 = arith.subi %c7_i32_72, %c3_i32 : i32
    %160 = arith.muli %arg0, %159 : i32
    %161 = arith.addi %158, %160 : i32
    %162 = arith.index_cast %161 : i32 to index
    %c0_73 = arith.constant 0 : index
    %c0_74 = arith.constant 0 : index
    %163 = vector.load %arg9[%162, %c0_73, %c0_74] : memref<8x8x384xf32, #tpu.memory_space<vmem>>, vector<1x8x384xf32>
    %164 = vector.shape_cast %163 : vector<1x8x384xf32> to vector<8x384xf32>
    %c0_75 = arith.constant 0 : index
    %c0_76 = arith.constant 0 : index
    %c0_77 = arith.constant 0 : index
    %165 = vector.load %arg5[%c0_75, %c0_76, %c0_77] : memref<1x128x384xf32, #tpu.memory_space<vmem>>, vector<1x128x384xf32>
    %166 = vector.shape_cast %165 : vector<1x128x384xf32> to vector<128x384xf32>
    %cst_78 = arith.constant dense<0.000000e+00> : vector<8x384xf32>
    %167 = tpu.matmul %152, %166, %cst_78 {dimension_numbers = #tpu.dot_dimension_numbers<[1], [0], [0], [1], [0, 0, 1, 1], [], []>} : vector<8x128xf32>, vector<128x384xf32>, vector<8x384xf32> -> vector<8x384xf32>
    %168 = vector.extract_strided_slice %164 {offsets = [0, 0], sizes = [8, 128], strides = [1, 1]} : vector<8x384xf32> to vector<8x128xf32>
    %169 = vector.extract_strided_slice %167 {offsets = [0, 0], sizes = [8, 128], strides = [1, 1]} : vector<8x384xf32> to vector<8x128xf32>
    %170 = arith.addf %168, %169 : vector<8x128xf32>
    %cst_79 = arith.constant 5.000000e-01 : f32
    %171 = vector.broadcast %cst_79 : f32 to vector<8x128xf32>
    %172 = arith.mulf %171, %170 : vector<8x128xf32>
    %173 = math.tanh %172 : vector<8x128xf32>
    %cst_80 = arith.constant 1.000000e+00 : f32
    %174 = vector.broadcast %cst_80 : f32 to vector<8x128xf32>
    %175 = arith.addf %173, %174 : vector<8x128xf32>
    %cst_81 = arith.constant 5.000000e-01 : f32
    %176 = vector.broadcast %cst_81 : f32 to vector<8x128xf32>
    %177 = arith.mulf %176, %175 : vector<8x128xf32>
    %178 = vector.extract_strided_slice %164 {offsets = [0, 128], sizes = [8, 128], strides = [1, 1]} : vector<8x384xf32> to vector<8x128xf32>
    %179 = vector.extract_strided_slice %167 {offsets = [0, 128], sizes = [8, 128], strides = [1, 1]} : vector<8x384xf32> to vector<8x128xf32>
    %180 = arith.addf %178, %179 : vector<8x128xf32>
    %cst_82 = arith.constant 5.000000e-01 : f32
    %181 = vector.broadcast %cst_82 : f32 to vector<8x128xf32>
    %182 = arith.mulf %181, %180 : vector<8x128xf32>
    %183 = math.tanh %182 : vector<8x128xf32>
    %cst_83 = arith.constant 1.000000e+00 : f32
    %184 = vector.broadcast %cst_83 : f32 to vector<8x128xf32>
    %185 = arith.addf %183, %184 : vector<8x128xf32>
    %cst_84 = arith.constant 5.000000e-01 : f32
    %186 = vector.broadcast %cst_84 : f32 to vector<8x128xf32>
    %187 = arith.mulf %186, %185 : vector<8x128xf32>
    %188 = vector.extract_strided_slice %164 {offsets = [0, 256], sizes = [8, 128], strides = [1, 1]} : vector<8x384xf32> to vector<8x128xf32>
    %189 = vector.extract_strided_slice %167 {offsets = [0, 256], sizes = [8, 128], strides = [1, 1]} : vector<8x384xf32> to vector<8x128xf32>
    %190 = arith.addf %189, %17 : vector<8x128xf32>
    %191 = arith.mulf %177, %190 : vector<8x128xf32>
    %192 = arith.addf %188, %191 : vector<8x128xf32>
    %193 = math.tanh %192 : vector<8x128xf32>
    %cst_85 = arith.constant 1.000000e+00 : f32
    %194 = vector.broadcast %cst_85 : f32 to vector<8x128xf32>
    %195 = arith.subf %194, %187 : vector<8x128xf32>
    %196 = arith.mulf %195, %193 : vector<8x128xf32>
    %197 = arith.mulf %187, %152 : vector<8x128xf32>
    %198 = arith.addf %196, %197 : vector<8x128xf32>
    %c0_86 = arith.constant 0 : index
    %199 = arith.index_cast %161 : i32 to index
    %c0_87 = arith.constant 0 : index
    %c0_88 = arith.constant 0 : index
    %200 = vector.load %arg7[%c0_86, %199, %c0_87, %c0_88] : memref<1x8x8x128xf32, #tpu.memory_space<vmem>>, vector<1x1x8x128xf32>
    %201 = vector.shape_cast %200 : vector<1x1x8x128xf32> to vector<8x128xf32>
    %202 = vector.shape_cast %198 : vector<8x128xf32> to vector<1x1x8x128xf32>
    tpu.vector_store %arg7[%c0_86, %199, %c0_87, %c0_88], %202 {strides = array<i32>} : memref<1x8x8x128xf32, #tpu.memory_space<vmem>>, vector<1x1x8x128xf32>,
    %c4_i32 = arith.constant 4 : i32
    %c1_i32_89 = arith.constant 1 : i32
    %203 = arith.subi %c1_i32_89, %arg0 : i32
    %204 = arith.muli %203, %c4_i32 : i32
    %c7_i32_90 = arith.constant 7 : i32
    %205 = arith.subi %c7_i32_90, %c4_i32 : i32
    %206 = arith.muli %arg0, %205 : i32
    %207 = arith.addi %204, %206 : i32
    %208 = arith.index_cast %207 : i32 to index
    %c0_91 = arith.constant 0 : index
    %c0_92 = arith.constant 0 : index
    %209 = vector.load %arg9[%208, %c0_91, %c0_92] : memref<8x8x384xf32, #tpu.memory_space<vmem>>, vector<1x8x384xf32>
    %210 = vector.shape_cast %209 : vector<1x8x384xf32> to vector<8x384xf32>
    %c0_93 = arith.constant 0 : index
    %c0_94 = arith.constant 0 : index
    %c0_95 = arith.constant 0 : index
    %211 = vector.load %arg5[%c0_93, %c0_94, %c0_95] : memref<1x128x384xf32, #tpu.memory_space<vmem>>, vector<1x128x384xf32>
    %212 = vector.shape_cast %211 : vector<1x128x384xf32> to vector<128x384xf32>
    %cst_96 = arith.constant dense<0.000000e+00> : vector<8x384xf32>
    %213 = tpu.matmul %198, %212, %cst_96 {dimension_numbers = #tpu.dot_dimension_numbers<[1], [0], [0], [1], [0, 0, 1, 1], [], []>} : vector<8x128xf32>, vector<128x384xf32>, vector<8x384xf32> -> vector<8x384xf32>
    %214 = vector.extract_strided_slice %210 {offsets = [0, 0], sizes = [8, 128], strides = [1, 1]} : vector<8x384xf32> to vector<8x128xf32>
    %215 = vector.extract_strided_slice %213 {offsets = [0, 0], sizes = [8, 128], strides = [1, 1]} : vector<8x384xf32> to vector<8x128xf32>
    %216 = arith.addf %214, %215 : vector<8x128xf32>
    %cst_97 = arith.constant 5.000000e-01 : f32
    %217 = vector.broadcast %cst_97 : f32 to vector<8x128xf32>
    %218 = arith.mulf %217, %216 : vector<8x128xf32>
    %219 = math.tanh %218 : vector<8x128xf32>
    %cst_98 = arith.constant 1.000000e+00 : f32
    %220 = vector.broadcast %cst_98 : f32 to vector<8x128xf32>
    %221 = arith.addf %219, %220 : vector<8x128xf32>
    %cst_99 = arith.constant 5.000000e-01 : f32
    %222 = vector.broadcast %cst_99 : f32 to vector<8x128xf32>
    %223 = arith.mulf %222, %221 : vector<8x128xf32>
    %224 = vector.extract_strided_slice %210 {offsets = [0, 128], sizes = [8, 128], strides = [1, 1]} : vector<8x384xf32> to vector<8x128xf32>
    %225 = vector.extract_strided_slice %213 {offsets = [0, 128], sizes = [8, 128], strides = [1, 1]} : vector<8x384xf32> to vector<8x128xf32>
    %226 = arith.addf %224, %225 : vector<8x128xf32>
    %cst_100 = arith.constant 5.000000e-01 : f32
    %227 = vector.broadcast %cst_100 : f32 to vector<8x128xf32>
    %228 = arith.mulf %227, %226 : vector<8x128xf32>
    %229 = math.tanh %228 : vector<8x128xf32>
    %cst_101 = arith.constant 1.000000e+00 : f32
    %230 = vector.broadcast %cst_101 : f32 to vector<8x128xf32>
    %231 = arith.addf %229, %230 : vector<8x128xf32>
    %cst_102 = arith.constant 5.000000e-01 : f32
    %232 = vector.broadcast %cst_102 : f32 to vector<8x128xf32>
    %233 = arith.mulf %232, %231 : vector<8x128xf32>
    %234 = vector.extract_strided_slice %210 {offsets = [0, 256], sizes = [8, 128], strides = [1, 1]} : vector<8x384xf32> to vector<8x128xf32>
    %235 = vector.extract_strided_slice %213 {offsets = [0, 256], sizes = [8, 128], strides = [1, 1]} : vector<8x384xf32> to vector<8x128xf32>
    %236 = arith.addf %235, %17 : vector<8x128xf32>
    %237 = arith.mulf %223, %236 : vector<8x128xf32>
    %238 = arith.addf %234, %237 : vector<8x128xf32>
    %239 = math.tanh %238 : vector<8x128xf32>
    %cst_103 = arith.constant 1.000000e+00 : f32
    %240 = vector.broadcast %cst_103 : f32 to vector<8x128xf32>
    %241 = arith.subf %240, %233 : vector<8x128xf32>
    %242 = arith.mulf %241, %239 : vector<8x128xf32>
    %243 = arith.mulf %233, %198 : vector<8x128xf32>
    %244 = arith.addf %242, %243 : vector<8x128xf32>
    %c0_104 = arith.constant 0 : index
    %245 = arith.index_cast %207 : i32 to index
    %c0_105 = arith.constant 0 : index
    %c0_106 = arith.constant 0 : index
    %246 = vector.load %arg7[%c0_104, %245, %c0_105, %c0_106] : memref<1x8x8x128xf32, #tpu.memory_space<vmem>>, vector<1x1x8x128xf32>
    %247 = vector.shape_cast %246 : vector<1x1x8x128xf32> to vector<8x128xf32>
    %248 = vector.shape_cast %244 : vector<8x128xf32> to vector<1x1x8x128xf32>
    tpu.vector_store %arg7[%c0_104, %245, %c0_105, %c0_106], %248 {strides = array<i32>} : memref<1x8x8x128xf32, #tpu.memory_space<vmem>>, vector<1x1x8x128xf32>,
    %c5_i32 = arith.constant 5 : i32
    %c1_i32_107 = arith.constant 1 : i32
    %249 = arith.subi %c1_i32_107, %arg0 : i32
    %250 = arith.muli %249, %c5_i32 : i32
    %c7_i32_108 = arith.constant 7 : i32
    %251 = arith.subi %c7_i32_108, %c5_i32 : i32
    %252 = arith.muli %arg0, %251 : i32
    %253 = arith.addi %250, %252 : i32
    %254 = arith.index_cast %253 : i32 to index
    %c0_109 = arith.constant 0 : index
    %c0_110 = arith.constant 0 : index
    %255 = vector.load %arg9[%254, %c0_109, %c0_110] : memref<8x8x384xf32, #tpu.memory_space<vmem>>, vector<1x8x384xf32>
    %256 = vector.shape_cast %255 : vector<1x8x384xf32> to vector<8x384xf32>
    %c0_111 = arith.constant 0 : index
    %c0_112 = arith.constant 0 : index
    %c0_113 = arith.constant 0 : index
    %257 = vector.load %arg5[%c0_111, %c0_112, %c0_113] : memref<1x128x384xf32, #tpu.memory_space<vmem>>, vector<1x128x384xf32>
    %258 = vector.shape_cast %257 : vector<1x128x384xf32> to vector<128x384xf32>
    %cst_114 = arith.constant dense<0.000000e+00> : vector<8x384xf32>
    %259 = tpu.matmul %244, %258, %cst_114 {dimension_numbers = #tpu.dot_dimension_numbers<[1], [0], [0], [1], [0, 0, 1, 1], [], []>} : vector<8x128xf32>, vector<128x384xf32>, vector<8x384xf32> -> vector<8x384xf32>
    %260 = vector.extract_strided_slice %256 {offsets = [0, 0], sizes = [8, 128], strides = [1, 1]} : vector<8x384xf32> to vector<8x128xf32>
    %261 = vector.extract_strided_slice %259 {offsets = [0, 0], sizes = [8, 128], strides = [1, 1]} : vector<8x384xf32> to vector<8x128xf32>
    %262 = arith.addf %260, %261 : vector<8x128xf32>
    %cst_115 = arith.constant 5.000000e-01 : f32
    %263 = vector.broadcast %cst_115 : f32 to vector<8x128xf32>
    %264 = arith.mulf %263, %262 : vector<8x128xf32>
    %265 = math.tanh %264 : vector<8x128xf32>
    %cst_116 = arith.constant 1.000000e+00 : f32
    %266 = vector.broadcast %cst_116 : f32 to vector<8x128xf32>
    %267 = arith.addf %265, %266 : vector<8x128xf32>
    %cst_117 = arith.constant 5.000000e-01 : f32
    %268 = vector.broadcast %cst_117 : f32 to vector<8x128xf32>
    %269 = arith.mulf %268, %267 : vector<8x128xf32>
    %270 = vector.extract_strided_slice %256 {offsets = [0, 128], sizes = [8, 128], strides = [1, 1]} : vector<8x384xf32> to vector<8x128xf32>
    %271 = vector.extract_strided_slice %259 {offsets = [0, 128], sizes = [8, 128], strides = [1, 1]} : vector<8x384xf32> to vector<8x128xf32>
    %272 = arith.addf %270, %271 : vector<8x128xf32>
    %cst_118 = arith.constant 5.000000e-01 : f32
    %273 = vector.broadcast %cst_118 : f32 to vector<8x128xf32>
    %274 = arith.mulf %273, %272 : vector<8x128xf32>
    %275 = math.tanh %274 : vector<8x128xf32>
    %cst_119 = arith.constant 1.000000e+00 : f32
    %276 = vector.broadcast %cst_119 : f32 to vector<8x128xf32>
    %277 = arith.addf %275, %276 : vector<8x128xf32>
    %cst_120 = arith.constant 5.000000e-01 : f32
    %278 = vector.broadcast %cst_120 : f32 to vector<8x128xf32>
    %279 = arith.mulf %278, %277 : vector<8x128xf32>
    %280 = vector.extract_strided_slice %256 {offsets = [0, 256], sizes = [8, 128], strides = [1, 1]} : vector<8x384xf32> to vector<8x128xf32>
    %281 = vector.extract_strided_slice %259 {offsets = [0, 256], sizes = [8, 128], strides = [1, 1]} : vector<8x384xf32> to vector<8x128xf32>
    %282 = arith.addf %281, %17 : vector<8x128xf32>
    %283 = arith.mulf %269, %282 : vector<8x128xf32>
    %284 = arith.addf %280, %283 : vector<8x128xf32>
    %285 = math.tanh %284 : vector<8x128xf32>
    %cst_121 = arith.constant 1.000000e+00 : f32
    %286 = vector.broadcast %cst_121 : f32 to vector<8x128xf32>
    %287 = arith.subf %286, %279 : vector<8x128xf32>
    %288 = arith.mulf %287, %285 : vector<8x128xf32>
    %289 = arith.mulf %279, %244 : vector<8x128xf32>
    %290 = arith.addf %288, %289 : vector<8x128xf32>
    %c0_122 = arith.constant 0 : index
    %291 = arith.index_cast %253 : i32 to index
    %c0_123 = arith.constant 0 : index
    %c0_124 = arith.constant 0 : index
    %292 = vector.load %arg7[%c0_122, %291, %c0_123, %c0_124] : memref<1x8x8x128xf32, #tpu.memory_space<vmem>>, vector<1x1x8x128xf32>
    %293 = vector.shape_cast %292 : vector<1x1x8x128xf32> to vector<8x128xf32>
    %294 = vector.shape_cast %290 : vector<8x128xf32> to vector<1x1x8x128xf32>
    tpu.vector_store %arg7[%c0_122, %291, %c0_123, %c0_124], %294 {strides = array<i32>} : memref<1x8x8x128xf32, #tpu.memory_space<vmem>>, vector<1x1x8x128xf32>,
    %c6_i32 = arith.constant 6 : i32
    %c1_i32_125 = arith.constant 1 : i32
    %295 = arith.subi %c1_i32_125, %arg0 : i32
    %296 = arith.muli %295, %c6_i32 : i32
    %c7_i32_126 = arith.constant 7 : i32
    %297 = arith.subi %c7_i32_126, %c6_i32 : i32
    %298 = arith.muli %arg0, %297 : i32
    %299 = arith.addi %296, %298 : i32
    %300 = arith.index_cast %299 : i32 to index
    %c0_127 = arith.constant 0 : index
    %c0_128 = arith.constant 0 : index
    %301 = vector.load %arg9[%300, %c0_127, %c0_128] : memref<8x8x384xf32, #tpu.memory_space<vmem>>, vector<1x8x384xf32>
    %302 = vector.shape_cast %301 : vector<1x8x384xf32> to vector<8x384xf32>
    %c0_129 = arith.constant 0 : index
    %c0_130 = arith.constant 0 : index
    %c0_131 = arith.constant 0 : index
    %303 = vector.load %arg5[%c0_129, %c0_130, %c0_131] : memref<1x128x384xf32, #tpu.memory_space<vmem>>, vector<1x128x384xf32>
    %304 = vector.shape_cast %303 : vector<1x128x384xf32> to vector<128x384xf32>
    %cst_132 = arith.constant dense<0.000000e+00> : vector<8x384xf32>
    %305 = tpu.matmul %290, %304, %cst_132 {dimension_numbers = #tpu.dot_dimension_numbers<[1], [0], [0], [1], [0, 0, 1, 1], [], []>} : vector<8x128xf32>, vector<128x384xf32>, vector<8x384xf32> -> vector<8x384xf32>
    %306 = vector.extract_strided_slice %302 {offsets = [0, 0], sizes = [8, 128], strides = [1, 1]} : vector<8x384xf32> to vector<8x128xf32>
    %307 = vector.extract_strided_slice %305 {offsets = [0, 0], sizes = [8, 128], strides = [1, 1]} : vector<8x384xf32> to vector<8x128xf32>
    %308 = arith.addf %306, %307 : vector<8x128xf32>
    %cst_133 = arith.constant 5.000000e-01 : f32
    %309 = vector.broadcast %cst_133 : f32 to vector<8x128xf32>
    %310 = arith.mulf %309, %308 : vector<8x128xf32>
    %311 = math.tanh %310 : vector<8x128xf32>
    %cst_134 = arith.constant 1.000000e+00 : f32
    %312 = vector.broadcast %cst_134 : f32 to vector<8x128xf32>
    %313 = arith.addf %311, %312 : vector<8x128xf32>
    %cst_135 = arith.constant 5.000000e-01 : f32
    %314 = vector.broadcast %cst_135 : f32 to vector<8x128xf32>
    %315 = arith.mulf %314, %313 : vector<8x128xf32>
    %316 = vector.extract_strided_slice %302 {offsets = [0, 128], sizes = [8, 128], strides = [1, 1]} : vector<8x384xf32> to vector<8x128xf32>
    %317 = vector.extract_strided_slice %305 {offsets = [0, 128], sizes = [8, 128], strides = [1, 1]} : vector<8x384xf32> to vector<8x128xf32>
    %318 = arith.addf %316, %317 : vector<8x128xf32>
    %cst_136 = arith.constant 5.000000e-01 : f32
    %319 = vector.broadcast %cst_136 : f32 to vector<8x128xf32>
    %320 = arith.mulf %319, %318 : vector<8x128xf32>
    %321 = math.tanh %320 : vector<8x128xf32>
    %cst_137 = arith.constant 1.000000e+00 : f32
    %322 = vector.broadcast %cst_137 : f32 to vector<8x128xf32>
    %323 = arith.addf %321, %322 : vector<8x128xf32>
    %cst_138 = arith.constant 5.000000e-01 : f32
    %324 = vector.broadcast %cst_138 : f32 to vector<8x128xf32>
    %325 = arith.mulf %324, %323 : vector<8x128xf32>
    %326 = vector.extract_strided_slice %302 {offsets = [0, 256], sizes = [8, 128], strides = [1, 1]} : vector<8x384xf32> to vector<8x128xf32>
    %327 = vector.extract_strided_slice %305 {offsets = [0, 256], sizes = [8, 128], strides = [1, 1]} : vector<8x384xf32> to vector<8x128xf32>
    %328 = arith.addf %327, %17 : vector<8x128xf32>
    %329 = arith.mulf %315, %328 : vector<8x128xf32>
    %330 = arith.addf %326, %329 : vector<8x128xf32>
    %331 = math.tanh %330 : vector<8x128xf32>
    %cst_139 = arith.constant 1.000000e+00 : f32
    %332 = vector.broadcast %cst_139 : f32 to vector<8x128xf32>
    %333 = arith.subf %332, %325 : vector<8x128xf32>
    %334 = arith.mulf %333, %331 : vector<8x128xf32>
    %335 = arith.mulf %325, %290 : vector<8x128xf32>
    %336 = arith.addf %334, %335 : vector<8x128xf32>
    %c0_140 = arith.constant 0 : index
    %337 = arith.index_cast %299 : i32 to index
    %c0_141 = arith.constant 0 : index
    %c0_142 = arith.constant 0 : index
    %338 = vector.load %arg7[%c0_140, %337, %c0_141, %c0_142] : memref<1x8x8x128xf32, #tpu.memory_space<vmem>>, vector<1x1x8x128xf32>
    %339 = vector.shape_cast %338 : vector<1x1x8x128xf32> to vector<8x128xf32>
    %340 = vector.shape_cast %336 : vector<8x128xf32> to vector<1x1x8x128xf32>
    tpu.vector_store %arg7[%c0_140, %337, %c0_141, %c0_142], %340 {strides = array<i32>} : memref<1x8x8x128xf32, #tpu.memory_space<vmem>>, vector<1x1x8x128xf32>,
    %c7_i32_143 = arith.constant 7 : i32
    %c1_i32_144 = arith.constant 1 : i32
    %341 = arith.subi %c1_i32_144, %arg0 : i32
    %342 = arith.muli %341, %c7_i32_143 : i32
    %c7_i32_145 = arith.constant 7 : i32
    %343 = arith.subi %c7_i32_145, %c7_i32_143 : i32
    %344 = arith.muli %arg0, %343 : i32
    %345 = arith.addi %342, %344 : i32
    %346 = arith.index_cast %345 : i32 to index
    %c0_146 = arith.constant 0 : index
    %c0_147 = arith.constant 0 : index
    %347 = vector.load %arg9[%346, %c0_146, %c0_147] : memref<8x8x384xf32, #tpu.memory_space<vmem>>, vector<1x8x384xf32>
    %348 = vector.shape_cast %347 : vector<1x8x384xf32> to vector<8x384xf32>
    %c0_148 = arith.constant 0 : index
    %c0_149 = arith.constant 0 : index
    %c0_150 = arith.constant 0 : index
    %349 = vector.load %arg5[%c0_148, %c0_149, %c0_150] : memref<1x128x384xf32, #tpu.memory_space<vmem>>, vector<1x128x384xf32>
    %350 = vector.shape_cast %349 : vector<1x128x384xf32> to vector<128x384xf32>
    %cst_151 = arith.constant dense<0.000000e+00> : vector<8x384xf32>
    %351 = tpu.matmul %336, %350, %cst_151 {dimension_numbers = #tpu.dot_dimension_numbers<[1], [0], [0], [1], [0, 0, 1, 1], [], []>} : vector<8x128xf32>, vector<128x384xf32>, vector<8x384xf32> -> vector<8x384xf32>
    %352 = vector.extract_strided_slice %348 {offsets = [0, 0], sizes = [8, 128], strides = [1, 1]} : vector<8x384xf32> to vector<8x128xf32>
    %353 = vector.extract_strided_slice %351 {offsets = [0, 0], sizes = [8, 128], strides = [1, 1]} : vector<8x384xf32> to vector<8x128xf32>
    %354 = arith.addf %352, %353 : vector<8x128xf32>
    %cst_152 = arith.constant 5.000000e-01 : f32
    %355 = vector.broadcast %cst_152 : f32 to vector<8x128xf32>
    %356 = arith.mulf %355, %354 : vector<8x128xf32>
    %357 = math.tanh %356 : vector<8x128xf32>
    %cst_153 = arith.constant 1.000000e+00 : f32
    %358 = vector.broadcast %cst_153 : f32 to vector<8x128xf32>
    %359 = arith.addf %357, %358 : vector<8x128xf32>
    %cst_154 = arith.constant 5.000000e-01 : f32
    %360 = vector.broadcast %cst_154 : f32 to vector<8x128xf32>
    %361 = arith.mulf %360, %359 : vector<8x128xf32>
    %362 = vector.extract_strided_slice %348 {offsets = [0, 128], sizes = [8, 128], strides = [1, 1]} : vector<8x384xf32> to vector<8x128xf32>
    %363 = vector.extract_strided_slice %351 {offsets = [0, 128], sizes = [8, 128], strides = [1, 1]} : vector<8x384xf32> to vector<8x128xf32>
    %364 = arith.addf %362, %363 : vector<8x128xf32>
    %cst_155 = arith.constant 5.000000e-01 : f32
    %365 = vector.broadcast %cst_155 : f32 to vector<8x128xf32>
    %366 = arith.mulf %365, %364 : vector<8x128xf32>
    %367 = math.tanh %366 : vector<8x128xf32>
    %cst_156 = arith.constant 1.000000e+00 : f32
    %368 = vector.broadcast %cst_156 : f32 to vector<8x128xf32>
    %369 = arith.addf %367, %368 : vector<8x128xf32>
    %cst_157 = arith.constant 5.000000e-01 : f32
    %370 = vector.broadcast %cst_157 : f32 to vector<8x128xf32>
    %371 = arith.mulf %370, %369 : vector<8x128xf32>
    %372 = vector.extract_strided_slice %348 {offsets = [0, 256], sizes = [8, 128], strides = [1, 1]} : vector<8x384xf32> to vector<8x128xf32>
    %373 = vector.extract_strided_slice %351 {offsets = [0, 256], sizes = [8, 128], strides = [1, 1]} : vector<8x384xf32> to vector<8x128xf32>
    %374 = arith.addf %373, %17 : vector<8x128xf32>
    %375 = arith.mulf %361, %374 : vector<8x128xf32>
    %376 = arith.addf %372, %375 : vector<8x128xf32>
    %377 = math.tanh %376 : vector<8x128xf32>
    %cst_158 = arith.constant 1.000000e+00 : f32
    %378 = vector.broadcast %cst_158 : f32 to vector<8x128xf32>
    %379 = arith.subf %378, %371 : vector<8x128xf32>
    %380 = arith.mulf %379, %377 : vector<8x128xf32>
    %381 = arith.mulf %371, %336 : vector<8x128xf32>
    %382 = arith.addf %380, %381 : vector<8x128xf32>
    %c0_159 = arith.constant 0 : index
    %383 = arith.index_cast %345 : i32 to index
    %c0_160 = arith.constant 0 : index
    %c0_161 = arith.constant 0 : index
    %384 = vector.load %arg7[%c0_159, %383, %c0_160, %c0_161] : memref<1x8x8x128xf32, #tpu.memory_space<vmem>>, vector<1x1x8x128xf32>
    %385 = vector.shape_cast %384 : vector<1x1x8x128xf32> to vector<8x128xf32>
    %386 = vector.shape_cast %382 : vector<8x128xf32> to vector<1x1x8x128xf32>
    tpu.vector_store %arg7[%c0_159, %383, %c0_160, %c0_161], %386 {strides = array<i32>} : memref<1x8x8x128xf32, #tpu.memory_space<vmem>>, vector<1x1x8x128xf32>,
    %c8_i32 = arith.constant 8 : i32
    %c0_162 = arith.constant 0 : index
    %c0_163 = arith.constant 0 : index
    %387 = vector.load %arg8[%c0_162, %c0_163] : memref<8x128xf32, #tpu.memory_space<vmem>>, vector<8x128xf32>
    tpu.vector_store %arg8[%c0_162, %c0_163], %382 {strides = array<i32>} : memref<8x128xf32, #tpu.memory_space<vmem>>, vector<8x128xf32>,
    return
  }
  func.func @transform_0(%arg0: i32, %arg1: i32) -> (i32, i32, i32) {
    %c1_i32 = arith.constant 1 : i32
    %0 = arith.subi %c1_i32, %arg0 : i32
    %1 = arith.muli %0, %arg1 : i32
    %c0_i32 = arith.constant 0 : i32
    %2 = arith.subi %c0_i32, %arg1 : i32
    %3 = arith.muli %arg0, %2 : i32
    %4 = arith.addi %1, %3 : i32
    %c0_i32_0 = arith.constant 0 : i32
    %c0_i32_1 = arith.constant 0 : i32
    %c0_i32_2 = arith.constant 0 : i32
    return %4, %c0_i32_0, %c0_i32_1 : i32, i32, i32
  }
  func.func @transform_1(%arg0: i32, %arg1: i32) -> (i32, i32, i32) {
    %c0_i32 = arith.constant 0 : i32
    %c0_i32_0 = arith.constant 0 : i32
    %c0_i32_1 = arith.constant 0 : i32
    return %arg0, %c0_i32, %c0_i32_0 : i32, i32, i32
  }
  func.func @transform_2(%arg0: i32, %arg1: i32) -> (i32, i32, i32) {
    %c0_i32 = arith.constant 0 : i32
    %c0_i32_0 = arith.constant 0 : i32
    %c0_i32_1 = arith.constant 0 : i32
    return %arg0, %c0_i32, %c0_i32_0 : i32, i32, i32
  }
  func.func @transform_3(%arg0: i32, %arg1: i32) -> (i32, i32, i32) {
    %c0_i32 = arith.constant 0 : i32
    %c0_i32_0 = arith.constant 0 : i32
    %c0_i32_1 = arith.constant 0 : i32
    return %arg0, %c0_i32, %c0_i32_0 : i32, i32, i32
  }
  func.func @transform_4(%arg0: i32, %arg1: i32) -> (i32, i32, i32) {
    %c0_i32 = arith.constant 0 : i32
    %c0_i32_0 = arith.constant 0 : i32
    %c0_i32_1 = arith.constant 0 : i32
    return %arg0, %c0_i32, %c0_i32_0 : i32, i32, i32
  }
  func.func @transform_5(%arg0: i32, %arg1: i32) -> (i32, i32, i32, i32) {
    %c1_i32 = arith.constant 1 : i32
    %0 = arith.subi %c1_i32, %arg0 : i32
    %1 = arith.muli %0, %arg1 : i32
    %c0_i32 = arith.constant 0 : i32
    %2 = arith.subi %c0_i32, %arg1 : i32
    %3 = arith.muli %arg0, %2 : i32
    %4 = arith.addi %1, %3 : i32
    %c0_i32_0 = arith.constant 0 : i32
    %c0_i32_1 = arith.constant 0 : i32
    %c0_i32_2 = arith.constant 0 : i32
    return %arg0, %4, %c0_i32_0, %c0_i32_1 : i32, i32, i32, i32
  }
}

</mosaic_0001>

<bundles_post_ra>
// kernel: tpu_custom_call.1
= control target key start
LH: loop header
LB: loop body
LE: loop exit
PB: predicated region body
PF: predicated region fallthrough
CT: control target
= control target key end

     0   :  { %s4846_s0 = inlined_call_operand.hbm [shape: f32[8,8,16], index: 0, kind: input, shape index: {}]   ;;  %s4847_s1 = inlined_call_operand.hbm [shape: f32[2,16,384], index: 1, kind: input, shape index: {}]   ;;  %s4848_s2 = inlined_call_operand.hbm [shape: f32[2,1,384], index: 2, kind: input, shape index: {}]   ;;  %s4849_s3 = inlined_call_operand.hbm [shape: f32[2,128,384], index: 3, kind: input, shape index: {}]   ;;  %s4850_s4 = inlined_call_operand.vmem [shape: f32[2,1,128], index: 4, kind: input, shape index: {}]   ;;  %s4851_s5 = inlined_call_operand.hbm [shape: f32[2,8,8,128], index: 5, kind: output, shape index: {}]  }
   0x1   :  { %4874 = sst [smem:[#allocation27_spill]] %s4847_s1 }
   0x2   :  { %10 = vsyncpa [#allocation5], 0 }
   0x3   :  { %12 = vsyncpa [#allocation5 + $0x1], 0 }
   0x4   :  { %13 = vsyncpa [#allocation8], 0 }
   0x5   :  { %15 = vsyncpa [#allocation8 + $0x1], 0 }
   0x6   :  { %16 = vsyncpa [#allocation11], 0 }
   0x7   :  { %18 = vsyncpa [#allocation11 + $0x1], 0 }
   0x8   :  { %19 = vsyncpa [#allocation6], 0 }
   0x9   :  { %21 = vsyncpa [#allocation6 + $0x1], 0  ;;  %s3625_s18 = smov 0   ;;  %s3627_s19 = smov 0  }
   0xa   :  { %s3629_s20 = smov 0   ;;  %s3631_s21 = smov 0  }
   0xb   :  { %s3633_s22 = smov 0   ;;  %s3635_s23 = smov 0  }
   0xc LB: > { %4875 = sst [smem:[#allocation17_spill]] %s3560_s18  ;;  %s3656_s24 = sadd.s32 4294967295, %s3580_s23   ;;  %s3580_s23 = sphi %s3635_s23, %s27_s23   ;;  %s3576_s22 = sphi %s3633_s22, %s4922_s22   ;;  %s3572_s21 = sphi %s3631_s21, %s4921_s21   ;;  %s3568_s20 = sphi %s3629_s20, %s4917_s20   ;;  %s3564_s19 = sphi %s3627_s19, %s4920_s19   ;;  %s3560_s18 = sphi %s3625_s18, %s4919_s18  }
   0xd   : > { %4876 = sst [smem:[#allocation18_spill]] %s3568_s20  ;;  %s2729_s25 = sadd.s32 4294967294, %s3580_s23  }
   0xe   : > { %4877 = sst [smem:[#allocation19_spill]] %s3580_s23  ;;  %s39_s26 = sadd.s32 1, %s3576_s22 }
   0xf   : > { %s82_s27 = sadd.s32 1, %s3568_s20  ;;  %p41_p0 = scmp.ge.s32.totalorder %s39_s26, 2 }
  0x10   : > { %p89_p1 = scmp.ne.s32.totalorder %s3568_s20, %s3564_s19  ;;  %p90_p2 = scmp.eq.s32.totalorder %s3580_s23, 0 }
  0x11   : > { %p95_p3 = scmp.ne.s32.totalorder %s3564_s19, %s3560_s18  ;;  %s4924_s26 = smov (%p41_p0, %s39_s26), 0 }
  0x12   : > { %4878 = sst [smem:[#allocation20_spill]] %s4924_s26  ;;  %p3670_p4 = por %p90_p2, %p89_p1 }
  0x13   : > { %p4853_p5 = scmp.eq.s32.totalorder %s3656_s24, 0  ;;  %s79_s29 = ssub.s32 %s3576_s22, %s4924_s26 }
  0x14   : > { %p209_p6 = scmp.eq.s32.totalorder %s3656_s24, 1  ;;  %p80_p7 = scmp.eq.s32.totalorder %s79_s29, 0 }
  0x15   : > { %p3680_p8 = por %p4853_p5, %p95_p3  ;;  %p215_p10 = scmp.eq.s32.totalorder %s2729_s25, 1 }
  0x16   : > { %p3684_p9 = por %p209_p6, %p89_p1  ;;  %p4854_p13 = scmp.lt.s32.totalorder %s3580_s23, 2 }
  0x17   : > { %s3689_s7 = scalar_select %p80_p7, %s3568_s20, %s82_s27  }
  0x18   : > { %s4881_s6 = scalar_select %p3684_p9, 1, 0 }
  0x19   : > { %4882 = sst [smem:[#allocation21_spill]] %s3689_s7  ;;  %p3691_p11 = por %p215_p10, %p95_p3 }
  0x1a   : > { %s261_s9 = sand.u32 1, %s3580_s23   ;;  %s3699_s10 = sand.u32 1, %s3568_s20  }
  0x1b   : > { %s4883_s8 = scalar_select %p3691_p11, 1, 0 }
  0x1c   : > { %s3234_s11 = smul.u32 48, %s3699_s10  ;;  %p3707_p0 = pnand %p4854_p13, %p3670_p4 }
  0x1d   : > { %4884 = sst [smem:[#allocation22_spill]] %s4883_s8  ;;  %s3235_s12 = smul.u32 768, %s3576_s22 }
  0x1e   : > { %s4886_s1 = sld [smem:[#allocation27_spill]]  ;;  %s265_s17 = scalar_lea.vmem [#allocation7], %s3234_s11 }
  0x1f   : > { %s272_s25 = sshll.u32 %s265_s17, 4  ;;  %p2736_p1 = scmp.ge.s32.totalorder %s3580_s23, 1  ;;  %s273_s25 = int_to_ptr.vmem [resolvable:$true] %s272_s25 }
  0x20   : > { %s3715_s27 = scalar_lea.sflag [#allocation8], %s261_s9  ;;  %p4855_p3 = pneg %p3707_p0 }
  0x21   : > { %s3395_s28 = scalar_lea.vmem %s273_s25, 768  ;;  %s3582_s29 = smov [#allocation7]  }
  0x22   : > { %p3396_p6 = scmp.ne.s32.totalorder %s273_s25, %s3395_s28  ;;  %s3400_s26 = sshll.u32 %s3582_s29, 4  ;;  %s3401_s26 = int_to_ptr.vmem [resolvable:$false] %s3400_s26 }
  0x23   : > { %s3402_s14 = scalar_lea.vmem %s3401_s26, 1536  ;;  %p3403_p10 = scmp.lt.s32.totalorder %s273_s25, %s3401_s26 }
  0x24   : > { %s271_s16 = scalar_lea.hbm %s4886_s1, %s3235_s12  ;;  %p3398_p4 = pnand %p3396_p6, %p4855_p3 }
  0x25   : > { %p3404_p12 = scmp.lt.s32.totalorder %s3402_s14, %s3395_s28 }
  0x26   : > { %p3399_p7 = pneg %p3398_p4 }
  0x27   : > { %p3405_p5 = por %p3404_p12, %p3403_p10 }
  0x29   : > { %p3406_p13 = pnand %p3405_p5, %p3399_p7 }
  0x2b   : > { %3409 = shalt.err (!%p3406_p13)
}
  0x2c   : > { %s4857_s11 = smov 384   ;;  %s4858_s9 = smov 24  }
  0x2d   : > { %3261 = dma.hbm_to_vmem [thread:$0]  (!%p3707_p0), %s271_s16, 768, %s273_s25, %s3715_s27, %s4857_s11, %s4857_s11, %s4858_s9  }
  0x2e   : > { %p326_p6 = scmp.lt.s32.totalorder %s3580_s23, 3  ;;  %s3585_s12 = smov [#allocation4]  }
  0x2f   : > { %s251_s15 = sshll.u32 %s3585_s12, 4  ;;  %p4888_p5 = scmp.lt.s32.totalorder %s3580_s23, 2  ;;  %s252_s15 = int_to_ptr.vmem [resolvable:$true] %s251_s15 }
  0x30   : > { %p3731_p4 = pnand %p2736_p1, %p326_p6  ;;  %s3236_s28 = smul.u32 3, %s3699_s10 }
  0x31   : > { %p3739_p12 = pnand %p4888_p5, %p90_p2  ;;  %s3421_s16 = scalar_lea.vmem %s252_s15, 1024 }
  0x32   : > { %p3422_p7 = scmp.ne.s32.totalorder %s252_s15, %s3421_s16  ;;  %s3428_s25 = scalar_lea.vmem %s252_s15, 2048 }
  0x33   : > { %p3412_p13 = pneg %p3739_p12  ;;  %p3429_p6 = scmp.lt.s32.totalorder %s252_s15, %s252_s15 }
  0x34   : > { %p3430_p3 = scmp.lt.s32.totalorder %s3428_s25, %s3421_s16 }
  0x35   : > { %p3424_p10 = pnand %p3422_p7, %p3412_p13 }
  0x36   : > { %p3431_p11 = por %p3430_p3, %p3429_p6 }
  0x37   : > { %p3425_p1 = pneg %p3424_p10 }
  0x39   : > { %p3432_p9 = pnand %p3431_p11, %p3425_p1 }
  0x3b   : > { %3435 = shalt.err (!%p3432_p9)
}
  0x3c   : > { %s3586_s29 = smov 128   ;;  %s3587_s14 = smov 8  }
  0x3d   : > { %3258 = dma.hbm_to_vmem [thread:$0]  (!%p3739_p12), %s4846_s0, 1024, %s252_s15, [#allocation5], %s3586_s29, %s3586_s29, %s3587_s14  }
  0x3e   : > { %s3237_s9 = smul.u32 48, %s3576_s22  ;;  %s286_s1 = scalar_lea.vmem [#allocation9], %s3236_s28 }
  0x3f   : > { %s294_s7 = sshll.u32 %s286_s1, 4  ;;  %p4890_p9 = pneg %p3707_p0  ;;  %s295_s7 = int_to_ptr.vmem [resolvable:$true] %s294_s7 }
  0x40   : > { %s292_s16 = scalar_lea.hbm %s4848_s2, %s3237_s9  ;;  %s3449_s25 = scalar_lea.vmem %s295_s7, 48 }
  0x41   : > { %p3450_p2 = scmp.ne.s32.totalorder %s295_s7, %s3449_s25  ;;  %s3588_s8 = smov [#allocation9]  }
  0x42   : > { %s3454_s17 = sshll.u32 %s3588_s8, 4  ;;  %s3455_s17 = int_to_ptr.vmem [resolvable:$false] %s3454_s17 }
  0x43   : > { %p3452_p11 = pnand %p3450_p2, %p4890_p9  ;;  %s3456_s18 = scalar_lea.vmem %s3455_s17, 96 }
  0x44   : > { %p3457_p5 = scmp.lt.s32.totalorder %s295_s7, %s3455_s17  ;;  %p3458_p12 = scmp.lt.s32.totalorder %s3456_s18, %s3449_s25 }
  0x45   : > { %p3453_p3 = pneg %p3452_p11 }
  0x46   : > { %p3459_p13 = por %p3458_p12, %p3457_p5 }
  0x48   : > { %p3460_p7 = pnand %p3459_p13, %p3453_p3 }
  0x4a   : > { %3463 = shalt.err (!%p3460_p7)
}
  0x4b   : > { %3264 = dma.hbm_to_vmem [thread:$0]  (!%p3707_p0), %s292_s16, 48, %s295_s7, %s3715_s27  }
  0x4c   : > { %s3238_s1 = smul.u32 384, %s3699_s10  ;;  %s302_s18 = scalar_lea.sflag [#allocation11], %s3699_s10 }
  0x4d   : > { %s3239_s20 = smul.u32 6144, %s3576_s22  ;;  %p4891_p1 = pmov %p4890_p9 }
  0x4e   : > { %s305_s9 = scalar_lea.vmem [#allocation10], %s3238_s1  ;;  %s3589_s29 = smov [#allocation10]  }
  0x4f   : > { %s311_s8 = scalar_lea.hbm %s4849_s3, %s3239_s20  ;;  %s312_s15 = sshll.u32 %s305_s9, 4  ;;  %s313_s15 = int_to_ptr.vmem [resolvable:$true] %s312_s15 }
  0x50   : > { %s3477_s28 = scalar_lea.vmem %s313_s15, 6144  ;;  %s3482_s14 = sshll.u32 %s3589_s29, 4  ;;  %s3483_s14 = int_to_ptr.vmem [resolvable:$false] %s3482_s14 }
  0x51   : > { %p3478_p10 = scmp.ne.s32.totalorder %s313_s15, %s3477_s28  ;;  %s3484_s7 = scalar_lea.vmem %s3483_s14, 12288 }
  0x52   : > { %p3485_p9 = scmp.lt.s32.totalorder %s313_s15, %s3483_s14  ;;  %p3486_p11 = scmp.lt.s32.totalorder %s3484_s7, %s3477_s28 }
  0x53   : > { %p3480_p6 = pnand %p3478_p10, %p4891_p1 }
  0x54   : > { %p3487_p3 = por %p3486_p11, %p3485_p9 }
  0x55   : > { %p3481_p2 = pneg %p3480_p6 }
  0x57   : > { %p3488_p5 = pnand %p3487_p3, %p3481_p2 }
  0x59   : > { %3491 = shalt.err (!%p3488_p5)
}
  0x5a   : > { %s4892_s27 = smov 24   ;;  %s4893_s12 = smov 384  }
  0x5b   : > { %3267 = dma.hbm_to_vmem [thread:$0]  (!%p3707_p0), %s311_s8, 6144, %s313_s15, %s302_s18, %s4893_s12, %s4893_s12, %s4892_s27  }
  0x5c   : > { %330 = sbr.rel (%p3731_p4) target bundleno = 2065 (0x811), region = 40 }
  0x61   : > { %p4894_p12 = scmp.eq.s32.totalorder %s3656_s24, 0 }
  0x63   : > { %3543 = dma.done.wait (%p4894_p12), [#allocation5], 1024   ;;  %p4895_p13 = pmov %p4894_p12 }
  0x64   : > { %s341_s10 = sand.u32 1, %s3656_s24   ;;  %s3783_s16 = sand.u32 1, %s3564_s19  }
  0x65   : > { %3545 = vsyncadd (%p4895_p13), [#allocation5], 4294966272  ;;  %s3240_s13 = smul.u32 48, %s3783_s16  ;;  %s342_s25 = scalar_lea.sflag [#allocation8], %s341_s10 }
  0x67   : > { %s3786_s17 = scalar_lea.vmem [#allocation7], %s3240_s13 }
  0x68   : > { %3547 = dma.done.wait (%p3680_p8), %s342_s25, 816  }
  0x69   : > { %3549 = vsyncadd (%p3680_p8), %s342_s25, 4294966480  ;;  %s3241_s26 = smul.u32 3, %s3783_s16  ;;  %s360_s24 = scalar_lea.sflag [#allocation11], %s3783_s16 }
  0x6a   : > { %s3242_s1 = smul.u32 384, %s3783_s16 }
  0x6b   : > { %s3794_s20 = scalar_lea.vmem [#allocation9], %s3241_s26 }
  0x6c   : > { %s3797_s23 = scalar_lea.vmem [#allocation10], %s3242_s1 }
  0x6d   : > { %3551 = dma.done.wait (%p3680_p8), %s360_s24, 6144  }
  0x6e   : > { %3553 = vsyncadd (%p3680_p8), %s360_s24, 4294961152  ;;  %v4864_v0 = vmov 0.0   ;;  %v440_v1 = vld [vmem:[%s3786_s17 + $0x20] sm:$0xff]  ;;  %v439_v2 = vld [vmem:[%s3786_s17 + $0x18] sm:$0xff]  ;;  %vm459_vm0 = vcmask 130048   ;;  %vm3591_vm1 = vmmov 0   ;;  %v444_v63 = vlaneseq }
  0x6f   : > { %548 = vmatprep.mubr.f32.mxu0 %v4864_v0  ;;  %v437_v3 = vld [vmem:[%s3786_s17 + $0x8] sm:$0xff]  ;;  %512 = vmatprep.subr.mxu0 %v440_v1  ;;  %v436_v4 = vld [vmem:[%s3786_s17] sm:$0xff]  ;;  %v438_v11 = vld [vmem:[%s3786_s17 + $0x10] sm:$0xff]  ;;  %s2783_s30 = smul.u32 168, %s3572_s21  ;;  %p414_p8 = scmp.lt.s32.totalorder %s3572_s21, 1 }
  0x70   : > { %v428_v5 = vld [vmem:[#allocation4] sm:$0xff]  ;;  %513 = vmatpush1.msra.mxu0 %v439_v2  ;;  %v3809_v6 = vld [vmem:[%s3797_s23 + $0x170] sm:$0xff]  ;;  %v3813_v7 = vld [vmem:[%s3797_s23 + $0x168] sm:$0xff]  ;;  %v445_v1 = vshrl.u32 %v444_v63, 7  ;;  %s2738_s28 = sshll.u32 %s3783_s16, 6  ;;  %s2758_s29 = smul.u32 56, %s3572_s21 }
  0x71   : > { %2942 = vmatprep.mubr.msk.f32.mxu1 %vm459_vm0, %v428_v5  ;;  %514 = vmatprep.subr.mxu0 %v437_v3  ;;  %v441_v8 = vld [vmem:[%s3786_s17 + $0x28] sm:$0xff]  ;;  %v430_v17 = vld [vmem:[#allocation4 + $0x10] sm:$0xff]  ;;  %v432_v27 = vld [vmem:[#allocation4 + $0x20] sm:$0xff]  ;;  %s737_s11 = scalar_lea.vmem [#allocation3], %s2783_s30  ;;  %s4150_s14 = scalar_lea.vmem [#allocation12], %s2738_s28 }
  0x72   : > { %515 = vmatpush1.msra.mxu0 %v436_v4  ;;  %v3817_v9 = vld [vmem:[%s3797_s23 + $0x158] sm:$0xff]  ;;  %2938 = vmatprep.subr.mxu1 %v441_v8  ;;  %v3822_v10 = vld [vmem:[%s3797_s23 + $0x150] sm:$0xff]  ;;  %v429_v12 = vld [vmem:[#allocation4 + $0x8] sm:$0xff]  ;;  %v446_v2 = vsub.s32 0, %v445_v1  ;;  %v450_v4 = vsub.s32 1, %v445_v1  ;;  %s415_s8 = scalar_select %p414_p8, %s3572_s21, 1 }
  0x73   : > { %2739 = vmatmul.mubr.msk.f32.vlgmr.msra.gmra.mxu0 %vm459_vm0, %v428_v5  ;;  %789 = vmatprep.subr.mxu0 %v3809_v6  ;;  %v3828_v13 = vld [vmem:[%s3797_s23 + $0x140] sm:$0xff]  ;;  %v3832_v14 = vld [vmem:[%s3797_s23 + $0x138] sm:$0xff]  ;;  %v3836_v15 = vld [vmem:[%s3797_s23 + $0x128] sm:$0xff]  ;;  %s949_s7 = scalar_lea.vmem %s4150_s14, %s2758_s29 [#allocation12]  ;;  %s952_s27 = smul.u32 6, %s3572_s21 }
  0x74   : > { %554 = vmatprep.mubr.f32.mxu0 %v4864_v0  ;;  %790 = vmatpush1.msra.mxu0 %v3813_v7  ;;  %v3841_v16 = vld [vmem:[%s3797_s23 + $0x120] sm:$0xff]  ;;  %v3846_v18 = vld [vmem:[%s3797_s23 + $0x110] sm:$0xff]  ;;  %v3850_v19 = vld [vmem:[%s3797_s23 + $0x108] sm:$0xff]  ;;  %s4142_s18 = scalar_lea.vmem %s4850_s4, %s415_s8  ;;  %s4226_s12 = ssub.s32 1, %s3572_s21 }
  0x75   : > { %791 = vmatprep.subr.mxu0 %v3817_v9  ;;  %2939 = vmatpush3.msra.mxu1 %v441_v8  ;;  %v3855_v20 = vld [vmem:[%s3797_s23 + $0xf8] sm:$0xff]  ;;  %v3860_v21 = vld [vmem:[%s3797_s23 + $0xf0] sm:$0xff]  ;;  %v3865_v23 = vld [vmem:[%s3797_s23 + $0xe0] sm:$0xff]  ;;  %s4229_s10 = sadd.s32 %s952_s27, %s4226_s12  ;;  %s1171_s1 = smul.u32 5, %s3572_s21 }
  0x76   : > { %792 = vmatpush1.msra.mxu0 %v3822_v10  ;;  %2940 = vmatprep.subr.mxu1 %v438_v11  ;;  %v431_v22 = vld [vmem:[#allocation4 + $0x18] sm:$0xff]  ;;  %v3875_v25 = vld [vmem:[%s3797_s23 + $0xc8] sm:$0xff]  ;;  %v3880_v26 = vld [vmem:[%s3797_s23 + $0xc0] sm:$0xff]  ;;  %s2784_s13 = smul.u32 24, %s4229_s10  ;;  %s2760_s17 = sshll.u32 %s4229_s10, 3 }
  0x77   : > { %2740 = vmatmul.mubr.msk.f32.gmra.mxu0 %vm459_vm0, %v429_v12  ;;  %793 = vmatprep.subr.mxu0 %v3828_v13  ;;  %v3870_v24 = vld [vmem:[%s3797_s23 + $0xd8] sm:$0xff]  ;;  %v3885_v28 = vld [vmem:[%s3797_s23 + $0xb0] sm:$0xff]  ;;  %v433_v29 = vld [vmem:[#allocation4 + $0x28] sm:$0xff]  ;;  %s1168_s26 = scalar_lea.vmem %s4150_s14, %s2760_s17 [#allocation12]  ;;  %s1389_s15 = smul.u32 3, %s4226_s12 }
  0x78   : > { %560 = vmatprep.mubr.f32.mxu0 %v4864_v0  ;;  %794 = vmatpush1.msra.mxu0 %v3832_v14  ;;  %v3890_v30 = vld [vmem:[%s3797_s23 + $0xa8] sm:$0xff]  ;;  %v3895_v32 = vld [vmem:[%s3797_s23 + $0x98] sm:$0xff]  ;;  %v3900_v33 = vld [vmem:[%s3797_s23 + $0x90] sm:$0xff]  ;;  %s956_s25 = scalar_lea.vmem [#allocation3], %s2784_s13  ;;  %s2764_s28 = sshll.u32 %s3572_s21, 2 }
  0x79   : > { %795 = vmatprep.subr.mxu0 %v3836_v15  ;;  %2941 = vmatpush3.msra.mxu1 %v438_v11  ;;  %v434_v31 = vld [vmem:[#allocation4 + $0x30] sm:$0xff]  ;;  %v435_v34 = vld [vmem:[#allocation4 + $0x38] sm:$0xff]  ;;  %v3905_v35 = vld [vmem:[%s3797_s23 + $0x80] sm:$0xff]  ;;  %v454_v11 = vsub.s32 2, %v445_v1  ;;  %s4536_s29 = sadd.s32 %s2764_s28, %s1389_s15  ;;  %s2767_s17 = sshll.u32 %s4226_s12, 2 }
  0x7a   : > { %796 = vmatpush1.msra.mxu0 %v3841_v16  ;;  %2943 = vmatmul.mubr.msk.f32.vlgmr.msra.gmra.mxu1 %vm459_vm0, %v429_v12  ;;  %v3912_v36 = vld [vmem:[%s3797_s23 + $0x78] sm:$0xff]  ;;  %v3920_v38 = vld [vmem:[%s3797_s23 + $0x68] sm:$0xff]  ;;  %v3925_v39 = vld [vmem:[%s3797_s23 + $0x160] sm:$0xff]  ;;  %s2766_s10 = sshll.u32 %s4536_s29, 3  ;;  %p4910_p4 = scmp.ne.s32.totalorder %s4881_s6, 0 }
  0x7b   : > { %2741 = vmatmul.mubr.msk.f32.gmra.mxu0 %vm459_vm0, %v430_v17  ;;  %797 = vmatprep.subr.mxu0 %v3846_v18  ;;  %v3915_v37 = vld [vmem:[%s3797_s23 + $0x178] sm:$0xff]  ;;  %v3930_v40 = vld [vmem:[%s3797_s23 + $0x60] sm:$0xff]  ;;  %v3935_v41 = vld [vmem:[%s3797_s23 + $0x50] sm:$0xff]  ;;  %s1606_s13 = scalar_lea.vmem %s4150_s14, %s2766_s10 [#allocation12] }
  0x7c   : > { %566 = vmatprep.mubr.f32.mxu0 %v4864_v0  ;;  %798 = vmatpush1.msra.mxu0 %v3850_v19  ;;  %v3940_v42 = vld [vmem:[%s3797_s23 + $0x48] sm:$0xff]  ;;  %v3948_v44 = vld [vmem:[%s3797_s23 + $0x38] sm:$0xff]  ;;  %v3953_v45 = vld [vmem:[%s3797_s23 + $0x30] sm:$0xff] }
  0x7d   : > { %799 = vmatprep.subr.mxu0 %v3855_v20  ;;  %2945 = vmatprep.mubr.msk.f32.mxu1 %vm459_vm0, %v430_v17  ;;  %v3943_v43 = vld [vmem:[%s3797_s23 + $0x148] sm:$0xff]  ;;  %v3958_v46 = vld [vmem:[%s3797_s23 + $0x130] sm:$0xff]  ;;  %v3961_v47 = vld [vmem:[%s3797_s23 + $0x20] sm:$0xff] }
  0x7e   : > { %800 = vmatpush1.msra.mxu0 %v3860_v21  ;;  %2946 = vmatmul.mubr.msk.f32.gmra.mxu1 %vm459_vm0, %v431_v22  ;;  %v3966_v48 = vld [vmem:[%s3797_s23 + $0x18] sm:$0xff]  ;;  %v3974_v50 = vld [vmem:[%s3797_s23 + $0x8] sm:$0xff]  ;;  %v3979_v51 = vld [vmem:[%s3797_s23] sm:$0xff] }
  0x7f   : > { %2742 = vmatmul.mubr.msk.f32.gmra.mxu0 %vm459_vm0, %v431_v22  ;;  %801 = vmatprep.subr.mxu0 %v3865_v23  ;;  %v3971_v49 = vld [vmem:[%s3797_s23 + $0x118] sm:$0xff]  ;;  %v3984_v52 = vld [vmem:[%s3797_s23 + $0x100] sm:$0xff]  ;;  %v3991_v53 = vld [vmem:[%s3797_s23 + $0xe8] sm:$0xff] }
  0x80   : > { %572 = vmatprep.mubr.f32.mxu0 %v4864_v0  ;;  %802 = vmatpush1.msra.mxu0 %v3870_v24  ;;  %v3998_v54 = vld [vmem:[%s3797_s23 + $0xd0] sm:$0xff]  ;;  %v4005_v55 = vld [vmem:[%s3797_s23 + $0xb8] sm:$0xff]  ;;  %v4012_v56 = vld [vmem:[%s3797_s23 + $0xa0] sm:$0xff] }
  0x81   : > { %803 = vmatprep.subr.mxu0 %v3875_v25  ;;  %2948 = vmatprep.mubr.msk.f32.mxu1 %vm459_vm0, %v432_v27  ;;  %v4019_v57 = vld [vmem:[%s3797_s23 + $0x88] sm:$0xff]  ;;  %v4026_v58 = vld [vmem:[%s3797_s23 + $0x70] sm:$0xff]  ;;  %v4033_v59 = vld [vmem:[%s3797_s23 + $0x58] sm:$0xff] }
  0x82   : > { %804 = vmatpush1.msra.mxu0 %v3880_v26  ;;  %2949 = vmatmul.mubr.msk.f32.gmra.mxu1 %vm459_vm0, %v433_v29  ;;  %v4040_v60 = vld [vmem:[%s3797_s23 + $0x40] sm:$0xff]  ;;  %v4047_v61 = vld [vmem:[%s3797_s23 + $0x28] sm:$0xff]  ;;  %v4054_v62 = vld [vmem:[%s3797_s23 + $0x10] sm:$0xff] }
  0x83   : > { %2743 = vmatmul.mubr.msk.f32.gmra.mxu0 %vm459_vm0, %v432_v27  ;;  %805 = vmatprep.subr.mxu0 %v3885_v28  ;;  %4896 = vst [vmem:[#allocation23_spill] sm:$0xff] %v4054_v62  ;;  %v442_v3 = vld [vmem:[%s3794_s20] sm:$0x7]  ;;  %s2761_s20 = sshll.u32 %s4226_s12, 1 }
  0x84   : > { %578 = vmatprep.mubr.f32.mxu0 %v4864_v0  ;;  %806 = vmatpush1.msra.mxu0 %v3890_v30  ;;  %v4116_v5 = vrot.slane %v442_v3, %v446_v2  ;;  %s4440_s24 = sadd.s32 %s2761_s20, %s1171_s1 }
  0x85   : > { %807 = vmatprep.subr.mxu0 %v3895_v32  ;;  %2951 = vmatprep.mubr.msk.f32.mxu1 %vm459_vm0, %v434_v31  ;;  %s2785_s30 = smul.u32 24, %s4440_s24  ;;  %s2763_s8 = sshll.u32 %s4440_s24, 3 }
  0x86   : > { %808 = vmatpush1.msra.mxu0 %v3900_v33  ;;  %2952 = vmatmul.mubr.msk.f32.gmra.mxu1 %vm459_vm0, %v435_v34  ;;  %s1387_s9 = scalar_lea.vmem %s4150_s14, %s2763_s8 [#allocation12]  ;;  %s2770_s8 = sshll.u32 %s3572_s21, 1 }
  0x87   : > { %2744 = vmatmul.mubr.msk.f32.gmra.mxu0 %vm459_vm0, %v433_v29  ;;  %809 = vmatprep.subr.mxu0 %v3905_v35  ;;  %v455_v29 = vrot.slane %v442_v3, %v454_v11 }
  0x88   : > { %584 = vmatprep.mubr.f32.mxu0 %v4864_v0  ;;  %2954 = vmatprep.subr.mxu1 %v4864_v0 }
  0x89   : > { %810 = vmatpush1.msra.mxu0 %v3912_v36  ;;  %2955 = vmatpush3.msra.mxu1 %v3915_v37 }
  0x8a   : > { %811 = vmatprep.subr.mxu0 %v3920_v38  ;;  %2956 = vmatprep.subr.mxu1 %v4864_v0 }
  0x8b   : > { %2745 = vmatmul.mubr.msk.f32.gmra.mxu0 %vm459_vm0, %v434_v31  ;;  %2957 = vmatpush3.msra.mxu1 %v3925_v39 }
  0x8c   : > { %590 = vmatprep.mubr.f32.mxu0 %v4864_v0  ;;  %812 = vmatpush1.msra.mxu0 %v3930_v40 }
  0x8d   : > { %813 = vmatprep.subr.mxu0 %v3935_v41  ;;  %2958 = vmatprep.subr.mxu1 %v4864_v0 }
  0x8e   : > { %814 = vmatpush1.msra.mxu0 %v3940_v42  ;;  %2959 = vmatpush3.msra.mxu1 %v3943_v43 }
  0x8f   : > { %2746 = vmatmul.mubr.msk.f32.gmra.mxu0 %vm459_vm0, %v435_v34  ;;  %815 = vmatprep.subr.mxu0 %v3948_v44 }
  0x90   : > { %2960 = vmatprep.subr.mxu1 %v4864_v0  ;;  %816 = vmatpush1.msra.mxu0 %v3953_v45 }
  0x91   : > { %2961 = vmatpush3.msra.mxu1 %v3958_v46  ;;  %817 = vmatprep.subr.mxu0 %v3961_v47 }
  0x92   : > { %2962 = vmatprep.subr.mxu1 %v4864_v0  ;;  %818 = vmatpush1.msra.mxu0 %v3966_v48 }
  0x93   : > { %2963 = vmatpush3.msra.mxu1 %v3971_v49  ;;  %819 = vmatprep.subr.mxu0 %v3974_v50 }
  0x94   : > { %2964 = vmatprep.subr.mxu1 %v4864_v0  ;;  %820 = vmatpush1.msra.mxu0 %v3979_v51 }
  0x95   : > { %853 = vmatprep.mubr.f32.mxu0 %v4864_v0  ;;  %2965 = vmatpush3.msra.mxu1 %v3984_v52 }
  0x96   : > { %854 = vmatmul.mubr.f32.vlgmr.msra.gmra.mxu0 %v4864_v0  ;;  %2966 = vmatprep.subr.mxu1 %v4864_v0 }
  0x97   : > { %2967 = vmatpush3.msra.mxu1 %v3991_v53  ;;  %2986 = vmatprep.mubr.msk.f32.mxu1 %vm3591_vm1, %v4864_v0 }
  0x98   : > { %2968 = vmatprep.subr.mxu1 %v4864_v0  ;;  %1008 = vmatprep.subr.mxu0 %v3809_v6 }
  0x99   : > { %2969 = vmatpush3.msra.mxu1 %v3998_v54  ;;  %1009 = vmatpush1.msra.mxu0 %v3813_v7 }
  0x9a   : > { %2970 = vmatprep.subr.mxu1 %v4864_v0  ;;  %1010 = vmatprep.subr.mxu0 %v3817_v9 }
  0x9b   : > { %2971 = vmatpush3.msra.mxu1 %v4005_v55  ;;  %1011 = vmatpush1.msra.mxu0 %v3822_v10 }
  0x9c   : > { %2972 = vmatprep.subr.mxu1 %v4864_v0  ;;  %1012 = vmatprep.subr.mxu0 %v3828_v13 }
  0x9d   : > { %2973 = vmatpush3.msra.mxu1 %v4012_v56  ;;  %1013 = vmatpush1.msra.mxu0 %v3832_v14 }
  0x9e   : > { %2974 = vmatprep.subr.mxu1 %v4864_v0  ;;  %1014 = vmatprep.subr.mxu0 %v3836_v15 }
  0x9f   : > { %2975 = vmatpush3.msra.mxu1 %v4019_v57  ;;  %1015 = vmatpush1.msra.mxu0 %v3841_v16 }
  0xa0   : > { %2976 = vmatprep.subr.mxu1 %v4864_v0  ;;  %1016 = vmatprep.subr.mxu0 %v3846_v18 }
  0xa1   : > { %2977 = vmatpush3.msra.mxu1 %v4026_v58  ;;  %1017 = vmatpush1.msra.mxu0 %v3850_v19 }
  0xa2   : > { %2978 = vmatprep.subr.mxu1 %v4864_v0  ;;  %1018 = vmatprep.subr.mxu0 %v3855_v20 }
  0xa3   : > { %2979 = vmatpush3.msra.mxu1 %v4033_v59  ;;  %1019 = vmatpush1.msra.mxu0 %v3860_v21 }
  0xa4   : > { %2980 = vmatprep.subr.mxu1 %v4864_v0  ;;  %1020 = vmatprep.subr.mxu0 %v3865_v23 }
  0xa5   : > { %2981 = vmatpush3.msra.mxu1 %v4040_v60  ;;  %1021 = vmatpush1.msra.mxu0 %v3870_v24 }
  0xa6   : > { %2982 = vmatprep.subr.mxu1 %v4864_v0  ;;  %1022 = vmatprep.subr.mxu0 %v3875_v25 }
  0xa7   : > { %2983 = vmatpush3.msra.mxu1 %v4047_v61  ;;  %1023 = vmatpush1.msra.mxu0 %v3880_v26 }
  0xa8   : > { %2984 = vmatprep.subr.mxu1 %v4864_v0  ;;  %1024 = vmatprep.subr.mxu0 %v3885_v28 }
  0xa9   : > { %2985 = vmatpush3.msra.mxu1 %v4054_v62  ;;  %1025 = vmatpush1.msra.mxu0 %v3890_v30 }
  0xaa   : > { %2987 = vmatmul.mubr.f32.vlgmr.msra.gmra.mxu1 %v4864_v0  ;;  %2989 = vmatprep.subr.mxu1 %v4864_v0 }
  0xab   : > { %2990 = vmatpush3.msra.mxu1 %v3915_v37  ;;  %1026 = vmatprep.subr.mxu0 %v3895_v32 }
  0xac   : > { %2991 = vmatprep.subr.mxu1 %v4864_v0  ;;  %1027 = vmatpush1.msra.mxu0 %v3900_v33 }
  0xad   : > { %2992 = vmatpush3.msra.mxu1 %v3925_v39  ;;  %1028 = vmatprep.subr.mxu0 %v3905_v35 }
  0xae   : > { %2993 = vmatprep.subr.mxu1 %v4864_v0  ;;  %1029 = vmatpush1.msra.mxu0 %v3912_v36 }
  0xaf   : > { %2994 = vmatpush3.msra.mxu1 %v3943_v43  ;;  %1030 = vmatprep.subr.mxu0 %v3920_v38 }
  0xb0   : > { %2995 = vmatprep.subr.mxu1 %v4864_v0  ;;  %1031 = vmatpush1.msra.mxu0 %v3930_v40 }
  0xb1   : > { %2996 = vmatpush3.msra.mxu1 %v3958_v46  ;;  %1032 = vmatprep.subr.mxu0 %v3935_v41 }
  0xb2   : > { %2997 = vmatprep.subr.mxu1 %v4864_v0  ;;  %1033 = vmatpush1.msra.mxu0 %v3940_v42 }
  0xb3   : > { %2998 = vmatpush3.msra.mxu1 %v3971_v49  ;;  %1034 = vmatprep.subr.mxu0 %v3948_v44 }
  0xb4   : > { %2999 = vmatprep.subr.mxu1 %v4864_v0  ;;  %1035 = vmatpush1.msra.mxu0 %v3953_v45 }
  0xb5   : > { %3000 = vmatpush3.msra.mxu1 %v3984_v52  ;;  %1036 = vmatprep.subr.mxu0 %v3961_v47 }
  0xb6   : > { %3001 = vmatprep.subr.mxu1 %v4864_v0  ;;  %1037 = vmatpush1.msra.mxu0 %v3966_v48 }
  0xb7   : > { %3002 = vmatpush3.msra.mxu1 %v3991_v53  ;;  %1038 = vmatprep.subr.mxu0 %v3974_v50 }
  0xb8   : > { %3003 = vmatprep.subr.mxu1 %v4864_v0  ;;  %1039 = vmatpush1.msra.mxu0 %v3979_v51 }
  0xb9   : > { %3004 = vmatpush3.msra.mxu1 %v3998_v54  ;;  %1072 = vmatprep.mubr.f32.mxu0 %v4864_v0 }
  0xba   : > { %3005 = vmatprep.subr.mxu1 %v4864_v0  ;;  %3021 = vmatprep.mubr.msk.f32.mxu1 %vm3591_vm1, %v4864_v0 }
  0xbb   : > { %3006 = vmatpush3.msra.mxu1 %v4005_v55  ;;  %1227 = vmatprep.subr.mxu0 %v3809_v6  ;;  %v4118_v6 = vrot.slane %v442_v3, %v450_v4 }
  0xbc   : > { %3007 = vmatprep.subr.mxu1 %v4864_v0 }
  0xbd   : > { %3008 = vmatpush3.msra.mxu1 %v4012_v56 }
  0xbe   : > { %3009 = vmatprep.subr.mxu1 %v4864_v0 }
  0xbf   : > { %3010 = vmatpush3.msra.mxu1 %v4019_v57 }
  0xc0   : > { %3011 = vmatprep.subr.mxu1 %v4864_v0 }
  0xc1   : > { %3012 = vmatpush3.msra.mxu1 %v4026_v58 }
  0xc2   : > { %3013 = vmatprep.subr.mxu1 %v4864_v0 }
  0xc3   : > { %3014 = vmatpush3.msra.mxu1 %v4033_v59 }
  0xc4   : > { %3015 = vmatprep.subr.mxu1 %v4864_v0 }
  0xc5   : > { %3016 = vmatpush3.msra.mxu1 %v4040_v60 }
  0xc6   : > { %3017 = vmatprep.subr.mxu1 %v4864_v0 }
  0xc7   : > { %3018 = vmatpush3.msra.mxu1 %v4047_v61 }
  0xc8   : > { %3019 = vmatprep.subr.mxu1 %v4864_v0 }
  0xc9   : > { %3020 = vmatpush3.msra.mxu1 %v4054_v62 }
  0xca   : > { %3024 = vmatprep.subr.mxu1 %v4864_v0 }
 0x133   : > { %v550_v8 = vpop.f32.mrf.mxu0 }
 0x134   : > { %v551_v12 = vadd.f32 %v550_v8, %v4116_v5 }
 0x135   : > { %v552_v17 = vpop.f32.mrf.mxu0 }
 0x136   : > { %702 = vst [vmem:[#allocation3] sm:$0xff] %v551_v12  ;;  %v553_v22 = vadd.f32 %v552_v17, %v4118_v6 }
 0x137   : > { %v556_v27 = vpop.f32.mrf.mxu0 }
 0x138   : > { %703 = vst [vmem:[#allocation3 + $0x8] sm:$0xff] %v553_v22  ;;  %v557_v31 = vadd.f32 %v556_v27, %v4116_v5 }
 0x139   : > { %v558_v34 = vpop.f32.mrf.mxu0 }
 0x13a   : > { %705 = vst [vmem:[#allocation3 + $0x18] sm:$0xff] %v557_v31  ;;  %v559_v63 = vadd.f32 %v558_v34, %v4118_v6  ;;  %v2944_v2 = vpop.f32.mrf.mxu1 }
 0x13b   : > { %v562_v4 = vpop.f32.mrf.mxu0  ;;  %v669_v0 = vadd.f32 %v2944_v2, %v455_v29 }
 0x13c   : > { %706 = vst [vmem:[#allocation3 + $0x20] sm:$0xff] %v559_v63  ;;  %v563_v1 = vadd.f32 %v562_v4, %v4116_v5  ;;  %v663_v8 = vpop.f32.mrf.mxu1 }
 0x13d   : > { %v564_v62 = vpop.f32.mrf.mxu0  ;;  %707 = vst [vmem:[#allocation3 + $0x28] sm:$0xff] %v669_v0  ;;  %v664_v12 = vadd.f32 %v663_v8, %v455_v29 }
 0x13e   : > { %708 = vst [vmem:[#allocation3 + $0x30] sm:$0xff] %v563_v1  ;;  %v565_v3 = vadd.f32 %v564_v62, %v4118_v6  ;;  %v2947_v11 = vpop.f32.mrf.mxu1 }
 0x13f   : > { %v568_v17 = vpop.f32.mrf.mxu0  ;;  %704 = vst [vmem:[#allocation3 + $0x10] sm:$0xff] %v664_v12  ;;  %v679_v22 = vadd.f32 %v2947_v11, %v455_v29 }
 0x140   : > { %709 = vst [vmem:[#allocation3 + $0x38] sm:$0xff] %v565_v3  ;;  %v569_v27 = vadd.f32 %v568_v17, %v4116_v5  ;;  %v673_v31 = vpop.f32.mrf.mxu1 }
 0x141   : > { %v570_v34 = vpop.f32.mrf.mxu0  ;;  %713 = vst [vmem:[#allocation3 + $0x58] sm:$0xff] %v679_v22  ;;  %v674_v63 = vadd.f32 %v673_v31, %v455_v29 }
 0x142   : > { %711 = vst [vmem:[#allocation3 + $0x48] sm:$0xff] %v569_v27  ;;  %v571_v2 = vadd.f32 %v570_v34, %v4118_v6  ;;  %v2950_v4 = vpop.f32.mrf.mxu1 }
 0x143   : > { %v574_v0 = vpop.f32.mrf.mxu0  ;;  %710 = vst [vmem:[#allocation3 + $0x40] sm:$0xff] %v674_v63  ;;  %v689_v1 = vadd.f32 %v2950_v4, %v455_v29 }
 0x144   : > { %712 = vst [vmem:[#allocation3 + $0x50] sm:$0xff] %v571_v2  ;;  %v575_v62 = vadd.f32 %v574_v0, %v4116_v5  ;;  %v683_v8 = vpop.f32.mrf.mxu1 }
 0x145   : > { %v576_v12 = vpop.f32.mrf.mxu0  ;;  %719 = vst [vmem:[#allocation3 + $0x88] sm:$0xff] %v689_v1  ;;  %v684_v3 = vadd.f32 %v683_v8, %v455_v29 }
 0x146   : > { %714 = vst [vmem:[#allocation3 + $0x60] sm:$0xff] %v575_v62  ;;  %v577_v11 = vadd.f32 %v576_v12, %v4118_v6  ;;  %v2953_v17 = vpop.f32.mrf.mxu1 }
 0x147   : > { %v580_v22 = vpop.f32.mrf.mxu0  ;;  %716 = vst [vmem:[#allocation3 + $0x70] sm:$0xff] %v684_v3  ;;  %v699_v27 = vadd.f32 %v2953_v17, %v455_v29 }
 0x148   : > { %715 = vst [vmem:[#allocation3 + $0x68] sm:$0xff] %v577_v11  ;;  %v581_v31 = vadd.f32 %v580_v22, %v4116_v5  ;;  %v693_v34 = vpop.f32.mrf.mxu1 }
 0x149   : > { %v582_v63 = vpop.f32.mrf.mxu0  ;;  %725 = vst [vmem:[#allocation3 + $0xb8] sm:$0xff] %v699_v27  ;;  %v694_v2 = vadd.f32 %v693_v34, %v455_v29 }
 0x14a   : > { %717 = vst [vmem:[#allocation3 + $0x78] sm:$0xff] %v581_v31  ;;  %v583_v4 = vadd.f32 %v582_v63, %v4118_v6 }
 0x14b   : > { %v586_v0 = vpop.f32.mrf.mxu0  ;;  %722 = vst [vmem:[#allocation3 + $0xa0] sm:$0xff] %v694_v2 }
 0x14c   : > { %718 = vst [vmem:[#allocation3 + $0x80] sm:$0xff] %v583_v4  ;;  %v587_v1 = vadd.f32 %v586_v0, %v4116_v5 }
 0x14d   : > { %v588_v62 = vpop.f32.mrf.mxu0 }
 0x14e   : > { %720 = vst [vmem:[#allocation3 + $0x90] sm:$0xff] %v587_v1  ;;  %v589_v8 = vadd.f32 %v588_v62, %v4118_v6 }
 0x14f   : > { %v592_v12 = vpop.f32.mrf.mxu0 }
 0x150   : > { %721 = vst [vmem:[#allocation3 + $0x98] sm:$0xff] %v589_v8  ;;  %v593_v3 = vadd.f32 %v592_v12, %v4116_v5 }
 0x151   : > { %v594_v29 = vpop.f32.mrf.mxu0 }
 0x152   : > { %723 = vst [vmem:[#allocation3 + $0xa8] sm:$0xff] %v593_v3  ;;  %v595_v11 = vadd.f32 %v594_v29, %v4118_v6  ;;  %v4145_v6 = vld [vmem:[%s4142_s18] ss:$0 sm:$0xff] }
 0x154   : > { %724 = vst [vmem:[#allocation3 + $0xb0] sm:$0xff] %v595_v11 }
 0x156   : > { %v855_v22 = vpop.f32.mrf.mxu0 }
 0x158   : > { %v857_v63 = vpop.f32.mrf.mxu0 }
 0x15b   : > { %v738_v17 = vld [vmem:[%s737_s11] sm:$0xff]  ;;  %v739_v34 = vld [vmem:[%s737_s11 + $0x8] sm:$0xff]  ;;  %v740_v29 = vld [vmem:[%s737_s11 + $0x10] sm:$0xff]  ;;  %s1175_s11 = scalar_lea.vmem [#allocation3], %s2785_s30 }
 0x15c   : > { %v930_v27 = vadd.f32 %v855_v22, %v738_v17  ;;  %v935_v2 = vadd.f32 %v857_v63, %v739_v34 }
 0x15e   : > { %v931_v31 = vmul.f32 0.5, %v930_v27  ;;  %v936_v4 = vmul.f32 0.5, %v935_v2 }
 0x160   : > { %3333 = vtanh.f32 %v931_v31 }
 0x161   : > { %3335 = vtanh.f32 %v936_v4 }
 0x16a   : > { %v926_v5 = vpop.f32.mrf.mxu1 }
 0x16b   : > { %v940_v8 = vadd.f32 %v4145_v6, %v926_v5  ;;  %v4897_v5 = vmov 0.0  }
 0x16c   : > { %v2988_v0 = vpop.f32.mrf.mxu1 }
 0x16d   : > { %v3334_v1 = vpop.eup %3333  ;;  %v4334_v0 = vld [vmem:[%s3797_s23 + $0xa8] sm:$0xff] }
 0x16e   : > { %v933_v62 = vadd.f32 1.0, %v3334_v1  ;;  %v3336_v17 = vpop.eup %3335  ;;  %v4337_v1 = vld [vmem:[%s3797_s23 + $0xb8] sm:$0xff] }
 0x16f   : > { %v938_v22 = vadd.f32 1.0, %v3336_v17  ;;  %v4368_v17 = vld [vmem:[%s3797_s23 + $0x68] sm:$0xff] }
 0x170   : > { %v934_v12 = vmul.f32 0.5, %v933_v62  ;;  %v4342_v62 = vld [vmem:[%s3797_s23 + $0x98] sm:$0xff] }
 0x171   : > { %v939_v27 = vmul.f32 0.5, %v938_v22  ;;  %v4373_v22 = vld [vmem:[%s3797_s23 + $0x60] sm:$0xff] }
 0x172   : > { %v941_v3 = vmul.f32 %v940_v8, %v934_v12  ;;  %v4347_v8 = vld [vmem:[%s3797_s23 + $0x90] sm:$0xff]  ;;  %v4350_v12 = vld [vmem:[%s3797_s23 + $0xa0] sm:$0xff] }
 0x173   : > { %v944_v31 = vsub.f32 1.0, %v939_v27  ;;  %v946_v63 = vmul.f32 0.0, %v939_v27  ;;  %v4376_v27 = vld [vmem:[%s3797_s23 + $0x70] sm:$0xff] }
 0x174   : > { %v942_v11 = vadd.f32 %v941_v3, %v740_v29  ;;  %v4355_v3 = vld [vmem:[%s3797_s23 + $0x80] sm:$0xff]  ;;  %v4360_v29 = vld [vmem:[%s3797_s23 + $0x78] sm:$0xff] }
 0x176   : > { %3337 = vtanh.f32 %v942_v11  ;;  %v4363_v11 = vld [vmem:[%s3797_s23 + $0x88] sm:$0xff] }
 0x183   : > { %v3338_v34 = vpop.eup %3337 }
 0x184   : > { %v945_v2 = vmul.f32 %v3338_v34, %v944_v31  ;;  %v4381_v31 = vld [vmem:[%s3797_s23 + $0x50] sm:$0xff]  ;;  %v4386_v34 = vld [vmem:[%s3797_s23 + $0x48] sm:$0xff] }
 0x186   : > { %v4153_v4 = vadd.f32 %v946_v63, %v945_v2  ;;  %v4389_v63 = vld [vmem:[%s3797_s23 + $0x58] sm:$0xff] }
 0x187   : > { %v4394_v2 = vld [vmem:[%s3797_s23 + $0x38] sm:$0xff] }
 0x188   : > { %950 = vst [vmem:[%s949_s7] sm:$0xff] %v4153_v4  ;;  %1073 = vmatmul.mubr.f32.vlgmr.msra.gmra.mxu0 %v4153_v4  ;;  %3022 = vmatmul.mubr.f32.vlgmr.msra.gmra.mxu1 %v4153_v4  ;;  %s2786_s7 = smul.u32 24, %s4536_s29 }
 0x189   : > { %1228 = vmatpush1.msra.mxu0 %v3813_v7  ;;  %3025 = vmatpush3.msra.mxu1 %v3915_v37  ;;  %v4898_v7 = vld [vmem:[#allocation23_spill] sm:$0xff] }
 0x18a   : > { %1229 = vmatprep.subr.mxu0 %v3817_v9  ;;  %3026 = vmatprep.subr.mxu1 %v4897_v5  ;;  %v957_v9 = vld [vmem:[%s956_s25] sm:$0xff]  ;;  %s1394_s27 = scalar_lea.vmem [#allocation3], %s2786_s7  ;;  %s2046_s7 = smul.u32 6, %s4226_s12 }
 0x18b   : > { %1230 = vmatpush1.msra.mxu0 %v3822_v10  ;;  %3027 = vmatpush3.msra.mxu1 %v3925_v39 }
 0x18c   : > { %1231 = vmatprep.subr.mxu0 %v3828_v13  ;;  %3028 = vmatprep.subr.mxu1 %v4897_v5 }
 0x18d   : > { %1232 = vmatpush1.msra.mxu0 %v3832_v14  ;;  %3029 = vmatpush3.msra.mxu1 %v3943_v43 }
 0x18e   : > { %1233 = vmatprep.subr.mxu0 %v3836_v15  ;;  %3030 = vmatprep.subr.mxu1 %v4897_v5 }
 0x18f   : > { %1234 = vmatpush1.msra.mxu0 %v3841_v16  ;;  %3031 = vmatpush3.msra.mxu1 %v3958_v46 }
 0x190   : > { %1235 = vmatprep.subr.mxu0 %v3846_v18  ;;  %3032 = vmatprep.subr.mxu1 %v4897_v5 }
 0x191   : > { %1236 = vmatpush1.msra.mxu0 %v3850_v19  ;;  %3033 = vmatpush3.msra.mxu1 %v3971_v49  ;;  %v958_v19 = vld [vmem:[%s956_s25 + $0x8] sm:$0xff] }
 0x192   : > { %1237 = vmatprep.subr.mxu0 %v3855_v20  ;;  %3034 = vmatprep.subr.mxu1 %v4897_v5 }
 0x193   : > { %1238 = vmatpush1.msra.mxu0 %v3860_v21  ;;  %3035 = vmatpush3.msra.mxu1 %v3984_v52 }
 0x194   : > { %1239 = vmatprep.subr.mxu0 %v3865_v23  ;;  %3036 = vmatprep.subr.mxu1 %v4897_v5 }
 0x195   : > { %1240 = vmatpush1.msra.mxu0 %v3870_v24  ;;  %3037 = vmatpush3.msra.mxu1 %v3991_v53  ;;  %v4272_v53 = vld [vmem:[%s3797_s23 + $0x138] sm:$0xff] }
 0x196   : > { %1241 = vmatprep.subr.mxu0 %v3875_v25  ;;  %3038 = vmatprep.subr.mxu1 %v4897_v5 }
 0x197   : > { %1242 = vmatpush1.msra.mxu0 %v3880_v26  ;;  %3039 = vmatpush3.msra.mxu1 %v3998_v54  ;;  %v4277_v54 = vld [vmem:[%s3797_s23 + $0x128] sm:$0xff] }
 0x198   : > { %1243 = vmatprep.subr.mxu0 %v3885_v28  ;;  %3040 = vmatprep.subr.mxu1 %v4897_v5 }
 0x199   : > { %1244 = vmatpush1.msra.mxu0 %v3890_v30  ;;  %3041 = vmatpush3.msra.mxu1 %v4005_v55  ;;  %v959_v30 = vld [vmem:[%s956_s25 + $0x10] sm:$0xff]  ;;  %s1609_s25 = smul.u32 3, %s3572_s21 }
 0x19a   : > { %1245 = vmatprep.subr.mxu0 %v3895_v32  ;;  %3042 = vmatprep.subr.mxu1 %v4897_v5  ;;  %v4287_v55 = vld [vmem:[%s3797_s23 + $0x110] sm:$0xff] }
 0x19b   : > { %1246 = vmatpush1.msra.mxu0 %v3900_v33  ;;  %3043 = vmatpush3.msra.mxu1 %v4012_v56  ;;  %v4297_v56 = vld [vmem:[%s3797_s23 + $0xf8] sm:$0xff] }
 0x19c   : > { %1247 = vmatprep.subr.mxu0 %v3905_v35  ;;  %3044 = vmatprep.subr.mxu1 %v4897_v5 }
 0x19d   : > { %1248 = vmatpush1.msra.mxu0 %v3912_v36  ;;  %3045 = vmatpush3.msra.mxu1 %v4019_v57  ;;  %v4307_v57 = vld [vmem:[%s3797_s23 + $0xe0] sm:$0xff] }
 0x19e   : > { %1249 = vmatprep.subr.mxu0 %v3920_v38  ;;  %3046 = vmatprep.subr.mxu1 %v4897_v5 }
 0x19f   : > { %1250 = vmatpush1.msra.mxu0 %v3930_v40  ;;  %3047 = vmatpush3.msra.mxu1 %v4026_v58  ;;  %v4315_v58 = vld [vmem:[%s3797_s23 + $0xe8] sm:$0xff] }
 0x1a0   : > { %1251 = vmatprep.subr.mxu0 %v3935_v41  ;;  %3048 = vmatprep.subr.mxu1 %v4897_v5 }
 0x1a1   : > { %1252 = vmatpush1.msra.mxu0 %v3940_v42  ;;  %3049 = vmatpush3.msra.mxu1 %v4033_v59  ;;  %v4318_v59 = vld [vmem:[%s3797_s23 + $0xc8] sm:$0xff] }
 0x1a2   : > { %1253 = vmatprep.subr.mxu0 %v3948_v44  ;;  %3050 = vmatprep.subr.mxu1 %v4897_v5  ;;  %v4245_v44 = vld [vmem:[%s3797_s23 + $0x170] sm:$0xff] }
 0x1a3   : > { %1254 = vmatpush1.msra.mxu0 %v3953_v45  ;;  %3051 = vmatpush3.msra.mxu1 %v4040_v60  ;;  %4899 = vst [vmem:[#allocation23_spill] sm:$0xff] %v4245_v44  ;;  %v4249_v45 = vld [vmem:[%s3797_s23 + $0x168] sm:$0xff]  ;;  %v4326_v60 = vld [vmem:[%s3797_s23 + $0xd0] sm:$0xff] }
 0x1a4   : > { %1255 = vmatprep.subr.mxu0 %v3961_v47  ;;  %3052 = vmatprep.subr.mxu1 %v4897_v5  ;;  %v4252_v47 = vld [vmem:[%s3797_s23 + $0x178] sm:$0xff] }
 0x1a5   : > { %1256 = vmatpush1.msra.mxu0 %v3966_v48  ;;  %3053 = vmatpush3.msra.mxu1 %v4047_v61  ;;  %v4257_v48 = vld [vmem:[%s3797_s23 + $0x158] sm:$0xff]  ;;  %v4329_v61 = vld [vmem:[%s3797_s23 + $0xb0] sm:$0xff] }
 0x1a6   : > { %1257 = vmatprep.subr.mxu0 %v3974_v50  ;;  %3054 = vmatprep.subr.mxu1 %v4897_v5  ;;  %v4262_v50 = vld [vmem:[%s3797_s23 + $0x150] sm:$0xff] }
 0x1a7   : > { %1258 = vmatpush1.msra.mxu0 %v3979_v51  ;;  %1291 = vmatprep.mubr.f32.mxu0 %v4897_v5  ;;  %v4267_v51 = vld [vmem:[%s3797_s23 + $0x140] sm:$0xff] }
 0x1a8   : > { %3055 = vmatpush3.msra.mxu1 %v4898_v7  ;;  %3056 = vmatprep.mubr.msk.f32.mxu1 %vm3591_vm1, %v4897_v5  ;;  %v4402_v7 = vld [vmem:[%s3797_s23 + $0x40] sm:$0xff] }
 0x1a9   : > { %3059 = vmatprep.subr.mxu1 %v4897_v5  ;;  %1446 = vmatprep.subr.mxu0 %v4245_v44 }
 0x248   : > { %v1074_v10 = vpop.f32.mrf.mxu0  ;;  %v1145_v13 = vpop.f32.mrf.mxu1 }
 0x249   : > { %v1149_v14 = vadd.f32 %v1074_v10, %v957_v9  ;;  %v1159_v26 = vadd.f32 %v4145_v6, %v1145_v13  ;;  %v4407_v9 = vld [vmem:[%s3797_s23 + $0x20] sm:$0xff]  ;;  %v4412_v10 = vld [vmem:[%s3797_s23 + $0x18] sm:$0xff]  ;;  %v4415_v13 = vld [vmem:[%s3797_s23 + $0x28] sm:$0xff] }
 0x24a   : > { %v3023_v15 = vpop.f32.mrf.mxu1  ;;  %v1076_v18 = vpop.f32.mrf.mxu0 }
 0x24b   : > { %v1150_v16 = vmul.f32 0.5, %v1149_v14  ;;  %v1154_v20 = vadd.f32 %v1076_v18, %v958_v19  ;;  %v4420_v14 = vld [vmem:[%s3797_s23 + $0x8] sm:$0xff]  ;;  %v4425_v15 = vld [vmem:[%s3797_s23] sm:$0xff] }
 0x24c   : > { %4900 = vst [vmem:[#allocation24_spill] sm:$0xff] %v4420_v14  ;;  %4901 = vst [vmem:[#allocation25_spill] sm:$0xff] %v4425_v15  ;;  %v1176_v18 = vld [vmem:[%s1175_s11] sm:$0xff] }
 0x24d   : > { %3339 = vtanh.f32 %v1150_v16  ;;  %v1155_v21 = vmul.f32 0.5, %v1154_v20  ;;  %v4428_v16 = vld [vmem:[%s3797_s23 + $0x10] sm:$0xff] }
 0x24e   : > { %4902 = vst [vmem:[#allocation26_spill] sm:$0xff] %v4428_v16 }
 0x24f   : > { %3341 = vtanh.f32 %v1155_v21 }
 0x25a   : > { %v3340_v23 = vpop.eup %3339 }
 0x25b   : > { %v1152_v24 = vadd.f32 1.0, %v3340_v23 }
 0x25c   : > { %v3342_v33 = vpop.eup %3341 }
 0x25d   : > { %v1153_v25 = vmul.f32 0.5, %v1152_v24  ;;  %v1157_v35 = vadd.f32 1.0, %v3342_v33 }
 0x25f   : > { %v1160_v28 = vmul.f32 %v1159_v26, %v1153_v25  ;;  %v1158_v36 = vmul.f32 0.5, %v1157_v35  ;;  %v1177_v26 = vld [vmem:[%s1175_s11 + $0x8] sm:$0xff] }
 0x261   : > { %v1161_v32 = vadd.f32 %v1160_v28, %v959_v30  ;;  %v1163_v37 = vsub.f32 1.0, %v1158_v36  ;;  %v1165_v40 = vmul.f32 %v1158_v36, %v4153_v4  ;;  %v4399_v4 = vld [vmem:[%s3797_s23 + $0x30] sm:$0xff] }
 0x263   : > { %3343 = vtanh.f32 %v1161_v32 }
 0x270   : > { %v3344_v38 = vpop.eup %3343 }
 0x271   : > { %v1164_v41 = vmul.f32 %v3344_v38, %v1163_v37  ;;  %v1178_v38 = vld [vmem:[%s1175_s11 + $0x10] sm:$0xff]  ;;  %s1827_s11 = smul.u32 5, %s4226_s12 }
 0x273   : > { %v4236_v42 = vadd.f32 %v1165_v40, %v1164_v41 }
 0x275   : > { %1169 = vst [vmem:[%s1168_s26] sm:$0xff] %v4236_v42  ;;  %1292 = vmatmul.mubr.f32.vlgmr.msra.gmra.mxu0 %v4236_v42  ;;  %3057 = vmatmul.mubr.f32.vlgmr.msra.gmra.mxu1 %v4236_v42  ;;  %s4617_s26 = sadd.s32 %s2767_s17, %s1609_s25  ;;  %s2790_s17 = smul.u32 168, %s4226_s12 }
 0x276   : > { %1510 = vmatprep.mubr.f32.mxu0 %v4897_v5  ;;  %3091 = vmatprep.mubr.msk.f32.mxu1 %vm3591_vm1, %v4897_v5  ;;  %s2787_s1 = smul.u32 24, %s4617_s26  ;;  %s2769_s24 = sshll.u32 %s4617_s26, 3 }
 0x277   : > { %1447 = vmatpush1.msra.mxu0 %v4249_v45  ;;  %3060 = vmatpush3.msra.mxu1 %v4252_v47  ;;  %s1825_s30 = scalar_lea.vmem %s4150_s14, %s2769_s24 [#allocation12]  ;;  %s2267_s26 = scalar_lea.vmem [#allocation3], %s2790_s17 }
 0x278   : > { %1448 = vmatprep.subr.mxu0 %v4257_v48  ;;  %3061 = vmatprep.subr.mxu1 %v4897_v5  ;;  %s1613_s20 = scalar_lea.vmem [#allocation3], %s2787_s1  ;;  %s2777_s1 = smul.u32 56, %s4226_s12 }
 0x279   : > { %1449 = vmatpush1.msra.mxu0 %v4262_v50  ;;  %3062 = vmatpush3.msra.mxu1 %v3925_v39  ;;  %v4282_v39 = vld [vmem:[%s3797_s23 + $0x120] sm:$0xff]  ;;  %s2503_s24 = sshll.u32 %s4150_s14, 4  ;;  %s2483_s12 = scalar_lea.sflag [#allocation6], %s3783_s16  ;;  %s4798_s24 = int_to_ptr.vmem [resolvable:$true] %s2503_s24 }
 0x27a   : > { %1450 = vmatprep.subr.mxu0 %v4267_v51  ;;  %3063 = vmatprep.subr.mxu1 %v4897_v5 }
 0x27b   : > { %1451 = vmatpush1.msra.mxu0 %v4272_v53  ;;  %3064 = vmatpush3.msra.mxu1 %v3943_v43  ;;  %v4292_v43 = vld [vmem:[%s3797_s23 + $0x108] sm:$0xff] }
 0x27c   : > { %1452 = vmatprep.subr.mxu0 %v4277_v54  ;;  %3065 = vmatprep.subr.mxu1 %v4897_v5 }
 0x27d   : > { %1453 = vmatpush1.msra.mxu0 %v4282_v39  ;;  %3066 = vmatpush3.msra.mxu1 %v3958_v46  ;;  %v4302_v46 = vld [vmem:[%s3797_s23 + $0xf0] sm:$0xff] }
 0x27e   : > { %1454 = vmatprep.subr.mxu0 %v4287_v55  ;;  %3067 = vmatprep.subr.mxu1 %v4897_v5 }
 0x27f   : > { %1455 = vmatpush1.msra.mxu0 %v4292_v43  ;;  %3068 = vmatpush3.msra.mxu1 %v3971_v49  ;;  %v4312_v49 = vld [vmem:[%s3797_s23 + $0xd8] sm:$0xff] }
 0x280   : > { %1456 = vmatprep.subr.mxu0 %v4297_v56  ;;  %3069 = vmatprep.subr.mxu1 %v4897_v5 }
 0x281   : > { %1457 = vmatpush1.msra.mxu0 %v4302_v46  ;;  %3070 = vmatpush3.msra.mxu1 %v3984_v52  ;;  %v4323_v52 = vld [vmem:[%s3797_s23 + $0xc0] sm:$0xff] }
 0x282   : > { %1458 = vmatprep.subr.mxu0 %v4307_v57  ;;  %3071 = vmatprep.subr.mxu1 %v4897_v5 }
 0x283   : > { %1459 = vmatpush1.msra.mxu0 %v4312_v49  ;;  %3072 = vmatpush3.msra.mxu1 %v4315_v58 }
 0x284   : > { %1460 = vmatprep.subr.mxu0 %v4318_v59  ;;  %3073 = vmatprep.subr.mxu1 %v4897_v5 }
 0x285   : > { %1461 = vmatpush1.msra.mxu0 %v4323_v52  ;;  %3074 = vmatpush3.msra.mxu1 %v4326_v60 }
 0x286   : > { %1462 = vmatprep.subr.mxu0 %v4329_v61  ;;  %3075 = vmatprep.subr.mxu1 %v4897_v5 }
 0x287   : > { %1463 = vmatpush1.msra.mxu0 %v4334_v0  ;;  %3076 = vmatpush3.msra.mxu1 %v4337_v1 }
 0x288   : > { %1464 = vmatprep.subr.mxu0 %v4342_v62  ;;  %3077 = vmatprep.subr.mxu1 %v4897_v5 }
 0x289   : > { %1465 = vmatpush1.msra.mxu0 %v4347_v8  ;;  %3078 = vmatpush3.msra.mxu1 %v4350_v12 }
 0x28a   : > { %1466 = vmatprep.subr.mxu0 %v4355_v3  ;;  %3079 = vmatprep.subr.mxu1 %v4897_v5 }
 0x28b   : > { %1467 = vmatpush1.msra.mxu0 %v4360_v29  ;;  %3080 = vmatpush3.msra.mxu1 %v4363_v11 }
 0x28c   : > { %1468 = vmatprep.subr.mxu0 %v4368_v17  ;;  %3081 = vmatprep.subr.mxu1 %v4897_v5 }
 0x28d   : > { %1469 = vmatpush1.msra.mxu0 %v4373_v22  ;;  %3082 = vmatpush3.msra.mxu1 %v4376_v27 }
 0x28e   : > { %1470 = vmatprep.subr.mxu0 %v4381_v31  ;;  %3083 = vmatprep.subr.mxu1 %v4897_v5 }
 0x28f   : > { %1471 = vmatpush1.msra.mxu0 %v4386_v34  ;;  %3084 = vmatpush3.msra.mxu1 %v4389_v63 }
 0x290   : > { %1472 = vmatprep.subr.mxu0 %v4394_v2  ;;  %3085 = vmatprep.subr.mxu1 %v4897_v5 }
 0x291   : > { %1473 = vmatpush1.msra.mxu0 %v4399_v4  ;;  %3086 = vmatpush3.msra.mxu1 %v4402_v7 }
 0x292   : > { %1474 = vmatprep.subr.mxu0 %v4407_v9  ;;  %3087 = vmatprep.subr.mxu1 %v4897_v5 }
 0x293   : > { %1475 = vmatpush1.msra.mxu0 %v4412_v10  ;;  %3088 = vmatpush3.msra.mxu1 %v4415_v13 }
 0x294   : > { %1476 = vmatprep.subr.mxu0 %v4420_v14  ;;  %3089 = vmatprep.subr.mxu1 %v4897_v5 }
 0x295   : > { %1477 = vmatpush1.msra.mxu0 %v4425_v15  ;;  %3090 = vmatpush3.msra.mxu1 %v4428_v16 }
 0x296   : > { %1665 = vmatprep.subr.mxu0 %v4245_v44  ;;  %3094 = vmatprep.subr.mxu1 %v4897_v5 }
 0x335   : > { %v1293_v19 = vpop.f32.mrf.mxu0  ;;  %v1364_v20 = vpop.f32.mrf.mxu1 }
 0x336   : > { %v1368_v21 = vadd.f32 %v1293_v19, %v1176_v18  ;;  %v1378_v36 = vadd.f32 %v4145_v6, %v1364_v20  ;;  %v4495_v20 = vld [vmem:[%s3797_s23 + $0x148] sm:$0xff] }
 0x337   : > { %v3058_v23 = vpop.f32.mrf.mxu1  ;;  %v1295_v25 = vpop.f32.mrf.mxu0 }
 0x338   : > { %v1369_v24 = vmul.f32 0.5, %v1368_v21  ;;  %v1373_v28 = vadd.f32 %v1295_v25, %v1177_v26 }
 0x33a   : > { %3345 = vtanh.f32 %v1369_v24  ;;  %v1374_v30 = vmul.f32 0.5, %v1373_v28  ;;  %v4500_v28 = vld [vmem:[%s3797_s23 + $0x130] sm:$0xff] }
 0x33c   : > { %3347 = vtanh.f32 %v1374_v30  ;;  %v4505_v30 = vld [vmem:[%s3797_s23 + $0x118] sm:$0xff] }
 0x347   : > { %v3346_v32 = vpop.eup %3345 }
 0x348   : > { %v1371_v33 = vadd.f32 1.0, %v3346_v32  ;;  %v4510_v32 = vld [vmem:[%s3797_s23 + $0x100] sm:$0xff] }
 0x349   : > { %v3348_v41 = vpop.eup %3347 }
 0x34a   : > { %v1372_v35 = vmul.f32 0.5, %v1371_v33  ;;  %v1376_v18 = vadd.f32 1.0, %v3348_v41  ;;  %v1395_v33 = vld [vmem:[%s1394_s27] sm:$0xff] }
 0x34c   : > { %v1379_v37 = vmul.f32 %v1378_v36, %v1372_v35  ;;  %v1377_v19 = vmul.f32 0.5, %v1376_v18  ;;  %v1396_v18 = vld [vmem:[%s1394_s27 + $0x8] sm:$0xff] }
 0x34e   : > { %v1380_v40 = vadd.f32 %v1379_v37, %v1178_v38  ;;  %v1382_v21 = vsub.f32 1.0, %v1377_v19  ;;  %v1384_v24 = vmul.f32 %v1377_v19, %v4236_v42  ;;  %v4490_v42 = vld [vmem:[%s3797_s23 + $0x160] sm:$0xff] }
 0x350   : > { %3349 = vtanh.f32 %v1380_v40 }
 0x35d   : > { %v3350_v23 = vpop.eup %3349 }
 0x35e   : > { %v1383_v25 = vmul.f32 %v3350_v23, %v1382_v21 }
 0x360   : > { %v4447_v26 = vadd.f32 %v1384_v24, %v1383_v25 }
 0x362   : > { %1388 = vst [vmem:[%s1387_s9] sm:$0xff] %v4447_v26  ;;  %1511 = vmatmul.mubr.f32.vlgmr.msra.gmra.mxu0 %v4447_v26  ;;  %3092 = vmatmul.mubr.f32.vlgmr.msra.gmra.mxu1 %v4447_v26  ;;  %s4697_s9 = sadd.s32 %s2770_s8, %s1827_s11 }
 0x363   : > { %1666 = vmatpush1.msra.mxu0 %v4249_v45  ;;  %3095 = vmatpush3.msra.mxu1 %v4252_v47  ;;  %s2788_s15 = smul.u32 24, %s4697_s9  ;;  %s2772_s29 = sshll.u32 %s4697_s9, 3 }
 0x364   : > { %1667 = vmatprep.subr.mxu0 %v4257_v48  ;;  %3096 = vmatprep.subr.mxu1 %v4897_v5 }
 0x365   : > { %1668 = vmatpush1.msra.mxu0 %v4262_v50  ;;  %1729 = vmatprep.mubr.f32.mxu0 %v4897_v5  ;;  %s1832_s28 = scalar_lea.vmem [#allocation3], %s2788_s15  ;;  %s3492_s15 = scalar_lea.vmem %s4798_s24, 1024 }
 0x366   : > { %1669 = vmatprep.subr.mxu0 %v4267_v51  ;;  %3126 = vmatprep.mubr.msk.f32.mxu1 %vm3591_vm1, %v4897_v5  ;;  %p3493_p0 = scmp.ne.s32.totalorder %s4798_s24, %s3492_s15 }
 0x367   : > { %1670 = vmatpush1.msra.mxu0 %v4272_v53  ;;  %3097 = vmatpush3.msra.mxu1 %v4490_v42 }
 0x368   : > { %1671 = vmatprep.subr.mxu0 %v4277_v54  ;;  %3098 = vmatprep.subr.mxu1 %v4897_v5  ;;  %p3494_p7 = pnand %p3493_p0, %p4910_p4 }
 0x369   : > { %1672 = vmatpush1.msra.mxu0 %v4282_v39  ;;  %3099 = vmatpush3.msra.mxu1 %v4495_v20 }
 0x36a   : > { %1673 = vmatprep.subr.mxu0 %v4287_v55  ;;  %3100 = vmatprep.subr.mxu1 %v4897_v5  ;;  %p3495_p10 = pneg %p3494_p7 }
 0x36b   : > { %1674 = vmatpush1.msra.mxu0 %v4292_v43  ;;  %3101 = vmatpush3.msra.mxu1 %v4500_v28 }
 0x36c   : > { %1675 = vmatprep.subr.mxu0 %v4297_v56  ;;  %3102 = vmatprep.subr.mxu1 %v4897_v5 }
 0x36d   : > { %1676 = vmatpush1.msra.mxu0 %v4302_v46  ;;  %3103 = vmatpush3.msra.mxu1 %v4505_v30 }
 0x36e   : > { %1677 = vmatprep.subr.mxu0 %v4307_v57  ;;  %3104 = vmatprep.subr.mxu1 %v4897_v5 }
 0x36f   : > { %1678 = vmatpush1.msra.mxu0 %v4312_v49  ;;  %3105 = vmatpush3.msra.mxu1 %v4510_v32 }
 0x370   : > { %1679 = vmatprep.subr.mxu0 %v4318_v59  ;;  %3106 = vmatprep.subr.mxu1 %v4897_v5 }
 0x371   : > { %1680 = vmatpush1.msra.mxu0 %v4323_v52  ;;  %3107 = vmatpush3.msra.mxu1 %v4315_v58 }
 0x372   : > { %1681 = vmatprep.subr.mxu0 %v4329_v61  ;;  %3108 = vmatprep.subr.mxu1 %v4897_v5 }
 0x373   : > { %1682 = vmatpush1.msra.mxu0 %v4334_v0  ;;  %3109 = vmatpush3.msra.mxu1 %v4326_v60 }
 0x374   : > { %1683 = vmatprep.subr.mxu0 %v4342_v62  ;;  %3110 = vmatprep.subr.mxu1 %v4897_v5 }
 0x375   : > { %1684 = vmatpush1.msra.mxu0 %v4347_v8  ;;  %3111 = vmatpush3.msra.mxu1 %v4337_v1 }
 0x376   : > { %1685 = vmatprep.subr.mxu0 %v4355_v3  ;;  %3112 = vmatprep.subr.mxu1 %v4897_v5 }
 0x377   : > { %1686 = vmatpush1.msra.mxu0 %v4360_v29  ;;  %3113 = vmatpush3.msra.mxu1 %v4350_v12 }
 0x378   : > { %1687 = vmatprep.subr.mxu0 %v4368_v17  ;;  %3114 = vmatprep.subr.mxu1 %v4897_v5 }
 0x379   : > { %1688 = vmatpush1.msra.mxu0 %v4373_v22  ;;  %3115 = vmatpush3.msra.mxu1 %v4363_v11 }
 0x37a   : > { %1689 = vmatprep.subr.mxu0 %v4381_v31  ;;  %3116 = vmatprep.subr.mxu1 %v4897_v5 }
 0x37b   : > { %1690 = vmatpush1.msra.mxu0 %v4386_v34  ;;  %3117 = vmatpush3.msra.mxu1 %v4376_v27 }
 0x37c   : > { %1691 = vmatprep.subr.mxu0 %v4394_v2  ;;  %3118 = vmatprep.subr.mxu1 %v4897_v5 }
 0x37d   : > { %1692 = vmatpush1.msra.mxu0 %v4399_v4  ;;  %3119 = vmatpush3.msra.mxu1 %v4389_v63 }
 0x37e   : > { %1693 = vmatprep.subr.mxu0 %v4407_v9  ;;  %3120 = vmatprep.subr.mxu1 %v4897_v5 }
 0x37f   : > { %1694 = vmatpush1.msra.mxu0 %v4412_v10  ;;  %3121 = vmatpush3.msra.mxu1 %v4402_v7 }
 0x380   : > { %1695 = vmatprep.subr.mxu0 %v4420_v14  ;;  %3122 = vmatprep.subr.mxu1 %v4897_v5 }
 0x381   : > { %1696 = vmatpush1.msra.mxu0 %v4425_v15  ;;  %3123 = vmatpush3.msra.mxu1 %v4415_v13  ;;  %v1397_v15 = vld [vmem:[%s1394_s27 + $0x10] sm:$0xff]  ;;  %s4780_s27 = sadd.s32 %s3572_s21, %s2046_s7 }
 0x382   : > { %1884 = vmatprep.subr.mxu0 %v4245_v44  ;;  %3124 = vmatprep.subr.mxu1 %v4897_v5  ;;  %s2789_s10 = smul.u32 24, %s4780_s27 }
 0x383   : > { %3125 = vmatpush3.msra.mxu1 %v4428_v16 }
 0x384   : > { %3129 = vmatprep.subr.mxu1 %v4897_v5 }
 0x422   : > { %v1512_v35 = vpop.f32.mrf.mxu0  ;;  %v1583_v36 = vpop.f32.mrf.mxu1 }
 0x423   : > { %v1587_v37 = vadd.f32 %v1512_v35, %v1395_v33  ;;  %v1597_v44 = vadd.f32 %v4145_v6, %v1583_v36 }
 0x424   : > { %v3093_v38 = vpop.f32.mrf.mxu1  ;;  %v1514_v41 = vpop.f32.mrf.mxu0 }
 0x425   : > { %v1588_v40 = vmul.f32 0.5, %v1587_v37  ;;  %v1592_v19 = vadd.f32 %v1514_v41, %v1396_v18 }
 0x427   : > { %3351 = vtanh.f32 %v1588_v40  ;;  %v1593_v21 = vmul.f32 0.5, %v1592_v19 }
 0x429   : > { %3353 = vtanh.f32 %v1593_v21 }
 0x434   : > { %v3352_v23 = vpop.eup %3351 }
 0x435   : > { %v1590_v24 = vadd.f32 1.0, %v3352_v23 }
 0x436   : > { %v3354_v33 = vpop.eup %3353 }
 0x437   : > { %v1591_v25 = vmul.f32 0.5, %v1590_v24  ;;  %v1595_v35 = vadd.f32 1.0, %v3354_v33 }
 0x439   : > { %v1598_v16 = vmul.f32 %v1597_v44, %v1591_v25  ;;  %v1596_v37 = vmul.f32 0.5, %v1595_v35  ;;  %v4903_v44 = vld [vmem:[#allocation24_spill] sm:$0xff] }
 0x43a   : > { %v1615_v35 = vld [vmem:[%s1613_s20 + $0x8] sm:$0xff] }
 0x43b   : > { %v1599_v14 = vadd.f32 %v1598_v16, %v1397_v15  ;;  %v1601_v38 = vsub.f32 1.0, %v1596_v37  ;;  %v1603_v41 = vmul.f32 %v1596_v37, %v4447_v26  ;;  %v4905_v15 = vld [vmem:[#allocation26_spill] sm:$0xff]  ;;  %v4906_v16 = vld [vmem:[#allocation23_spill] sm:$0xff] }
 0x43c   : > { %v1614_v26 = vld [vmem:[%s1613_s20] sm:$0xff] }
 0x43d   : > { %3355 = vtanh.f32 %v1599_v14  ;;  %v4904_v14 = vld [vmem:[#allocation25_spill] sm:$0xff] }
 0x44a   : > { %v3356_v40 = vpop.eup %3355 }
 0x44b   : > { %v1602_v18 = vmul.f32 %v3356_v40, %v1601_v38 }
 0x44d   : > { %v4543_v19 = vadd.f32 %v1603_v41, %v1602_v18 }
 0x44f   : > { %1607 = vst [vmem:[%s1606_s13] sm:$0xff] %v4543_v19  ;;  %1730 = vmatmul.mubr.f32.vlgmr.msra.gmra.mxu0 %v4543_v19  ;;  %3127 = vmatmul.mubr.f32.vlgmr.msra.gmra.mxu1 %v4543_v19  ;;  %s2050_s13 = scalar_lea.vmem [#allocation3], %s2789_s10 }
 0x450   : > { %1885 = vmatpush1.msra.mxu0 %v4249_v45  ;;  %3130 = vmatpush3.msra.mxu1 %v4252_v47 }
 0x451   : > { %1886 = vmatprep.subr.mxu0 %v4257_v48  ;;  %3131 = vmatprep.subr.mxu1 %v4897_v5 }
 0x452   : > { %1887 = vmatpush1.msra.mxu0 %v4262_v50  ;;  %3132 = vmatpush3.msra.mxu1 %v4490_v42 }
 0x453   : > { %1888 = vmatprep.subr.mxu0 %v4267_v51  ;;  %3133 = vmatprep.subr.mxu1 %v4897_v5 }
 0x454   : > { %1889 = vmatpush1.msra.mxu0 %v4272_v53  ;;  %3134 = vmatpush3.msra.mxu1 %v4495_v20 }
 0x455   : > { %1890 = vmatprep.subr.mxu0 %v4277_v54  ;;  %3135 = vmatprep.subr.mxu1 %v4897_v5 }
 0x456   : > { %1891 = vmatpush1.msra.mxu0 %v4282_v39  ;;  %3136 = vmatpush3.msra.mxu1 %v4500_v28 }
 0x457   : > { %1892 = vmatprep.subr.mxu0 %v4287_v55  ;;  %3137 = vmatprep.subr.mxu1 %v4897_v5 }
 0x458   : > { %1893 = vmatpush1.msra.mxu0 %v4292_v43  ;;  %3138 = vmatpush3.msra.mxu1 %v4505_v30 }
 0x459   : > { %1894 = vmatprep.subr.mxu0 %v4297_v56  ;;  %3139 = vmatprep.subr.mxu1 %v4897_v5 }
 0x45a   : > { %1895 = vmatpush1.msra.mxu0 %v4302_v46  ;;  %3140 = vmatpush3.msra.mxu1 %v4510_v32 }
 0x45b   : > { %1896 = vmatprep.subr.mxu0 %v4307_v57  ;;  %3141 = vmatprep.subr.mxu1 %v4897_v5 }
 0x45c   : > { %1897 = vmatpush1.msra.mxu0 %v4312_v49  ;;  %3142 = vmatpush3.msra.mxu1 %v4315_v58 }
 0x45d   : > { %1898 = vmatprep.subr.mxu0 %v4318_v59  ;;  %3143 = vmatprep.subr.mxu1 %v4897_v5 }
 0x45e   : > { %1899 = vmatpush1.msra.mxu0 %v4323_v52  ;;  %3144 = vmatpush3.msra.mxu1 %v4326_v60 }
 0x45f   : > { %1900 = vmatprep.subr.mxu0 %v4329_v61  ;;  %3145 = vmatprep.subr.mxu1 %v4897_v5 }
 0x460   : > { %1901 = vmatpush1.msra.mxu0 %v4334_v0  ;;  %3146 = vmatpush3.msra.mxu1 %v4337_v1 }
 0x461   : > { %1902 = vmatprep.subr.mxu0 %v4342_v62  ;;  %3147 = vmatprep.subr.mxu1 %v4897_v5 }
 0x462   : > { %1903 = vmatpush1.msra.mxu0 %v4347_v8  ;;  %3148 = vmatpush3.msra.mxu1 %v4350_v12 }
 0x463   : > { %1904 = vmatprep.subr.mxu0 %v4355_v3  ;;  %3149 = vmatprep.subr.mxu1 %v4897_v5 }
 0x464   : > { %1905 = vmatpush1.msra.mxu0 %v4360_v29  ;;  %3150 = vmatpush3.msra.mxu1 %v4363_v11 }
 0x465   : > { %1906 = vmatprep.subr.mxu0 %v4368_v17  ;;  %3151 = vmatprep.subr.mxu1 %v4897_v5 }
 0x466   : > { %1907 = vmatpush1.msra.mxu0 %v4373_v22  ;;  %3152 = vmatpush3.msra.mxu1 %v4376_v27 }
 0x467   : > { %1908 = vmatprep.subr.mxu0 %v4381_v31  ;;  %3153 = vmatprep.subr.mxu1 %v4897_v5 }
 0x468   : > { %1909 = vmatpush1.msra.mxu0 %v4386_v34  ;;  %3154 = vmatpush3.msra.mxu1 %v4389_v63 }
 0x469   : > { %1910 = vmatprep.subr.mxu0 %v4394_v2  ;;  %3155 = vmatprep.subr.mxu1 %v4897_v5 }
 0x46a   : > { %1911 = vmatpush1.msra.mxu0 %v4399_v4  ;;  %3156 = vmatpush3.msra.mxu1 %v4402_v7 }
 0x46b   : > { %1912 = vmatprep.subr.mxu0 %v4407_v9  ;;  %3157 = vmatprep.subr.mxu1 %v4897_v5 }
 0x46c   : > { %1913 = vmatpush1.msra.mxu0 %v4412_v10  ;;  %3158 = vmatpush3.msra.mxu1 %v4415_v13 }
 0x46d   : > { %1914 = vmatprep.subr.mxu0 %v4903_v44  ;;  %3159 = vmatprep.subr.mxu1 %v4897_v5 }
 0x46e   : > { %1915 = vmatpush1.msra.mxu0 %v4904_v14  ;;  %1948 = vmatprep.mubr.f32.mxu0 %v4897_v5  ;;  %v1616_v14 = vld [vmem:[%s1613_s20 + $0x10] sm:$0xff]  ;;  %s2791_s20 = sshll.u32 %s3572_s21, 10  ;;  %s3592_s21 = smov [#allocation12]  }
 0x46f   : > { %3160 = vmatpush3.msra.mxu1 %v4905_v15  ;;  %3161 = vmatprep.mubr.msk.f32.mxu1 %vm3591_vm1, %v4897_v5  ;;  %s4796_s9 = scalar_lea.hbm %s4851_s5, %s2791_s20 }
 0x470   : > { %2102 = vmatprep.subr.mxu0 %v4906_v16  ;;  %3164 = vmatprep.subr.mxu1 %v4897_v5 }
 0x50f   : > { %v1731_v36 = vpop.f32.mrf.mxu0  ;;  %v1802_v21 = vpop.f32.mrf.mxu1 }
 0x510   : > { %v1806_v23 = vadd.f32 %v1731_v36, %v1614_v26  ;;  %v1816_v16 = vadd.f32 %v4145_v6, %v1802_v21  ;;  %v4907_v6 = vld [vmem:[#allocation24_spill] sm:$0xff]  ;;  %v2293_v21 = vld [vmem:[%s3797_s23 + $0xb0] sm:$0xff] }
 0x511   : > { %v3128_v24 = vpop.f32.mrf.mxu1  ;;  %v1733_v33 = vpop.f32.mrf.mxu0 }
 0x512   : > { %v1807_v25 = vmul.f32 0.5, %v1806_v23  ;;  %v1811_v37 = vadd.f32 %v1733_v33, %v1615_v35 }
 0x514   : > { %3357 = vtanh.f32 %v1807_v25  ;;  %v1812_v38 = vmul.f32 0.5, %v1811_v37 }
 0x516   : > { %3359 = vtanh.f32 %v1812_v38  ;;  %v2292_v38 = vld [vmem:[%s3797_s23 + $0xa8] sm:$0xff] }
 0x521   : > { %v3358_v40 = vpop.eup %3357 }
 0x522   : > { %v1809_v41 = vadd.f32 1.0, %v3358_v40  ;;  %v2294_v40 = vld [vmem:[%s3797_s23 + $0xb8] sm:$0xff] }
 0x523   : > { %v3360_v26 = vpop.eup %3359 }
 0x524   : > { %v1810_v18 = vmul.f32 0.5, %v1809_v41  ;;  %v1814_v36 = vadd.f32 1.0, %v3360_v26  ;;  %v2289_v41 = vld [vmem:[%s3797_s23 + $0x90] sm:$0xff]  ;;  %v2286_v26 = vld [vmem:[%s3797_s23 + $0x78] sm:$0xff] }
 0x526   : > { %v1817_v15 = vmul.f32 %v1816_v16, %v1810_v18  ;;  %v1815_v23 = vmul.f32 0.5, %v1814_v36  ;;  %v2291_v18 = vld [vmem:[%s3797_s23 + $0xa0] sm:$0xff]  ;;  %v2288_v36 = vld [vmem:[%s3797_s23 + $0x88] sm:$0xff] }
 0x527   : > { %v2287_v16 = vld [vmem:[%s3797_s23 + $0x80] sm:$0xff] }
 0x528   : > { %v1818_v44 = vadd.f32 %v1817_v15, %v1616_v14  ;;  %v1820_v24 = vsub.f32 1.0, %v1815_v23  ;;  %v1822_v33 = vmul.f32 %v1815_v23, %v4543_v19  ;;  %v2299_v19 = vld [vmem:[%s3797_s23 + $0xe0] sm:$0xff]  ;;  %v2296_v14 = vld [vmem:[%s3797_s23 + $0xc8] sm:$0xff] }
 0x529   : > { %v2295_v15 = vld [vmem:[%s3797_s23 + $0xc0] sm:$0xff]  ;;  %v2284_v23 = vld [vmem:[%s3797_s23 + $0x68] sm:$0xff] }
 0x52a   : > { %3361 = vtanh.f32 %v1818_v44  ;;  %v2300_v44 = vld [vmem:[%s3797_s23 + $0xe8] sm:$0xff] }
 0x537   : > { %v3362_v25 = vpop.eup %3361 }
 0x538   : > { %v1821_v35 = vmul.f32 %v3362_v25, %v1820_v24  ;;  %v2283_v24 = vld [vmem:[%s3797_s23 + $0x60] sm:$0xff]  ;;  %v2285_v25 = vld [vmem:[%s3797_s23 + $0x70] sm:$0xff] }
 0x53a   : > { %v4624_v37 = vadd.f32 %v1822_v33, %v1821_v35  ;;  %v2281_v33 = vld [vmem:[%s3797_s23 + $0x50] sm:$0xff]  ;;  %v2280_v35 = vld [vmem:[%s3797_s23 + $0x48] sm:$0xff] }
 0x53c   : > { %1826 = vst [vmem:[%s1825_s30] sm:$0xff] %v4624_v37  ;;  %1949 = vmatmul.mubr.f32.vlgmr.msra.gmra.mxu0 %v4624_v37  ;;  %3162 = vmatmul.mubr.f32.vlgmr.msra.gmra.mxu1 %v4624_v37  ;;  %s2479_s30 = scalar_lea.vmem %s4150_s14, %s2777_s1 [#allocation12] }
 0x53d   : > { %2103 = vmatpush1.msra.mxu0 %v4249_v45  ;;  %3165 = vmatpush3.msra.mxu1 %v4252_v47  ;;  %v4908_v45 = vld [vmem:[#allocation25_spill] sm:$0xff]  ;;  %v4909_v47 = vld [vmem:[#allocation26_spill] sm:$0xff] }
 0x53e   : > { %2104 = vmatprep.subr.mxu0 %v4257_v48  ;;  %3166 = vmatprep.subr.mxu1 %v4897_v5  ;;  %v1833_v48 = vld [vmem:[%s1832_s28] sm:$0xff] }
 0x53f   : > { %2105 = vmatpush1.msra.mxu0 %v4262_v50  ;;  %3167 = vmatpush3.msra.mxu1 %v4490_v42 }
 0x540   : > { %2106 = vmatprep.subr.mxu0 %v4267_v51  ;;  %3168 = vmatprep.subr.mxu1 %v4897_v5 }
 0x541   : > { %2107 = vmatpush1.msra.mxu0 %v4272_v53  ;;  %3169 = vmatpush3.msra.mxu1 %v4495_v20 }
 0x542   : > { %2108 = vmatprep.subr.mxu0 %v4277_v54  ;;  %3170 = vmatprep.subr.mxu1 %v4897_v5 }
 0x543   : > { %2109 = vmatpush1.msra.mxu0 %v4282_v39  ;;  %3171 = vmatpush3.msra.mxu1 %v4500_v28 }
 0x544   : > { %2110 = vmatprep.subr.mxu0 %v4287_v55  ;;  %3172 = vmatprep.subr.mxu1 %v4897_v5 }
 0x545   : > { %2111 = vmatpush1.msra.mxu0 %v4292_v43  ;;  %3173 = vmatpush3.msra.mxu1 %v4505_v30  ;;  %v1834_v43 = vld [vmem:[%s1832_s28 + $0x8] sm:$0xff] }
 0x546   : > { %2112 = vmatprep.subr.mxu0 %v4297_v56  ;;  %3174 = vmatprep.subr.mxu1 %v4897_v5 }
 0x547   : > { %2113 = vmatpush1.msra.mxu0 %v4302_v46  ;;  %3175 = vmatpush3.msra.mxu1 %v4510_v32 }
 0x548   : > { %2114 = vmatprep.subr.mxu0 %v4307_v57  ;;  %3176 = vmatprep.subr.mxu1 %v4897_v5 }
 0x549   : > { %2115 = vmatpush1.msra.mxu0 %v4312_v49  ;;  %3177 = vmatpush3.msra.mxu1 %v4315_v58 }
 0x54a   : > { %2116 = vmatprep.subr.mxu0 %v4318_v59  ;;  %3178 = vmatprep.subr.mxu1 %v4897_v5  ;;  %v4701_v59 = vld [vmem:[%s4142_s18] ss:$0 sm:$0xff]  ;;  %s2044_s18 = scalar_lea.vmem %s4150_s14, %s2772_s29 [#allocation12] }
 0x54b   : > { %2117 = vmatpush1.msra.mxu0 %v4323_v52  ;;  %3179 = vmatpush3.msra.mxu1 %v4326_v60 }
 0x54c   : > { %2118 = vmatprep.subr.mxu0 %v4329_v61  ;;  %3180 = vmatprep.subr.mxu1 %v4897_v5  ;;  %v1835_v61 = vld [vmem:[%s1832_s28 + $0x10] sm:$0xff] }
 0x54d   : > { %2119 = vmatpush1.msra.mxu0 %v4334_v0  ;;  %3181 = vmatpush3.msra.mxu1 %v4337_v1 }
 0x54e   : > { %2120 = vmatprep.subr.mxu0 %v4342_v62  ;;  %3182 = vmatprep.subr.mxu1 %v4897_v5 }
 0x54f   : > { %2121 = vmatpush1.msra.mxu0 %v4347_v8  ;;  %3183 = vmatpush3.msra.mxu1 %v4350_v12 }
 0x550   : > { %2122 = vmatprep.subr.mxu0 %v4355_v3  ;;  %3184 = vmatprep.subr.mxu1 %v4897_v5 }
 0x551   : > { %2123 = vmatpush1.msra.mxu0 %v4360_v29  ;;  %3185 = vmatpush3.msra.mxu1 %v4363_v11 }
 0x552   : > { %2124 = vmatprep.subr.mxu0 %v4368_v17  ;;  %3186 = vmatprep.subr.mxu1 %v4897_v5 }
 0x553   : > { %2125 = vmatpush1.msra.mxu0 %v4373_v22  ;;  %3187 = vmatpush3.msra.mxu1 %v4376_v27  ;;  %v2317_v22 = vld [vmem:[%s3797_s23 + $0x170] sm:$0xff]  ;;  %v2316_v27 = vld [vmem:[%s3797_s23 + $0x168] sm:$0xff] }
 0x554   : > { %2126 = vmatprep.subr.mxu0 %v4381_v31  ;;  %3188 = vmatprep.subr.mxu1 %v4897_v5  ;;  %v2318_v31 = vld [vmem:[%s3797_s23 + $0x178] sm:$0xff] }
 0x555   : > { %2127 = vmatpush1.msra.mxu0 %v4386_v34  ;;  %3189 = vmatpush3.msra.mxu1 %v4389_v63  ;;  %v2314_v34 = vld [vmem:[%s3797_s23 + $0x158] sm:$0xff]  ;;  %v2313_v63 = vld [vmem:[%s3797_s23 + $0x150] sm:$0xff] }
 0x556   : > { %2128 = vmatprep.subr.mxu0 %v4394_v2  ;;  %3190 = vmatprep.subr.mxu1 %v4897_v5  ;;  %v2311_v2 = vld [vmem:[%s3797_s23 + $0x140] sm:$0xff] }
 0x557   : > { %2129 = vmatpush1.msra.mxu0 %v4399_v4  ;;  %3191 = vmatpush3.msra.mxu1 %v4402_v7  ;;  %v2310_v4 = vld [vmem:[%s3797_s23 + $0x138] sm:$0xff]  ;;  %v2308_v7 = vld [vmem:[%s3797_s23 + $0x128] sm:$0xff] }
 0x558   : > { %2130 = vmatprep.subr.mxu0 %v4407_v9  ;;  %3192 = vmatprep.subr.mxu1 %v4897_v5  ;;  %v2307_v9 = vld [vmem:[%s3797_s23 + $0x120] sm:$0xff] }
 0x559   : > { %2131 = vmatpush1.msra.mxu0 %v4412_v10  ;;  %3193 = vmatpush3.msra.mxu1 %v4415_v13  ;;  %v2305_v10 = vld [vmem:[%s3797_s23 + $0x110] sm:$0xff]  ;;  %v2304_v13 = vld [vmem:[%s3797_s23 + $0x108] sm:$0xff] }
 0x55a   : > { %2132 = vmatprep.subr.mxu0 %v4907_v6  ;;  %3194 = vmatprep.subr.mxu1 %v4897_v5  ;;  %v2278_v6 = vld [vmem:[%s3797_s23 + $0x38] sm:$0xff] }
 0x55b   : > { %2133 = vmatpush1.msra.mxu0 %v4908_v45  ;;  %2166 = vmatprep.mubr.f32.mxu0 %v4897_v5  ;;  %v2277_v45 = vld [vmem:[%s3797_s23 + $0x30] sm:$0xff] }
 0x55c   : > { %3195 = vmatpush3.msra.mxu1 %v4909_v47  ;;  %3196 = vmatprep.mubr.msk.f32.mxu1 %vm3591_vm1, %v4897_v5  ;;  %v2279_v47 = vld [vmem:[%s3797_s23 + $0x40] sm:$0xff] }
 0x55d   : > { %3199 = vmatprep.subr.mxu1 %v4897_v5  ;;  %2319 = vmatprep.subr.mxu0 %v2317_v22 }
 0x5fc   : > { %v1950_v50 = vpop.f32.mrf.mxu0  ;;  %v2021_v51 = vpop.f32.mrf.mxu1 }
 0x5fd   : > { %v2025_v53 = vadd.f32 %v1950_v50, %v1833_v48  ;;  %v2035_v52 = vadd.f32 %v4701_v59, %v2021_v51  ;;  %v2275_v48 = vld [vmem:[%s3797_s23 + $0x20] sm:$0xff]  ;;  %v2274_v50 = vld [vmem:[%s3797_s23 + $0x18] sm:$0xff]  ;;  %v2276_v51 = vld [vmem:[%s3797_s23 + $0x28] sm:$0xff] }
 0x5fe   : > { %v3163_v54 = vpop.f32.mrf.mxu1  ;;  %v1952_v55 = vpop.f32.mrf.mxu0 }
 0x5ff   : > { %v2026_v39 = vmul.f32 0.5, %v2025_v53  ;;  %v2030_v56 = vadd.f32 %v1952_v55, %v1834_v43  ;;  %v2272_v53 = vld [vmem:[%s3797_s23 + $0x8] sm:$0xff]  ;;  %v2271_v54 = vld [vmem:[%s3797_s23] sm:$0xff] }
 0x600   : > { %v2051_v55 = vld [vmem:[%s2050_s13] sm:$0xff] }
 0x601   : > { %3363 = vtanh.f32 %v2026_v39  ;;  %v2031_v46 = vmul.f32 0.5, %v2030_v56  ;;  %v2273_v39 = vld [vmem:[%s3797_s23 + $0x10] sm:$0xff] }
 0x603   : > { %3365 = vtanh.f32 %v2031_v46 }
 0x60e   : > { %v3364_v57 = vpop.eup %3363 }
 0x60f   : > { %v2028_v49 = vadd.f32 1.0, %v3364_v57 }
 0x610   : > { %v3366_v1 = vpop.eup %3365 }
 0x611   : > { %v2029_v58 = vmul.f32 0.5, %v2028_v49  ;;  %v2033_v62 = vadd.f32 1.0, %v3366_v1 }
 0x613   : > { %v2036_v60 = vmul.f32 %v2035_v52, %v2029_v58  ;;  %v2034_v8 = vmul.f32 0.5, %v2033_v62  ;;  %v2052_v52 = vld [vmem:[%s2050_s13 + $0x8] sm:$0xff] }
 0x615   : > { %v2037_v0 = vadd.f32 %v2036_v60, %v1835_v61  ;;  %v2039_v12 = vsub.f32 1.0, %v2034_v8  ;;  %v2041_v29 = vmul.f32 %v2034_v8, %v4624_v37  ;;  %v2282_v37 = vld [vmem:[%s3797_s23 + $0x58] sm:$0xff] }
 0x617   : > { %3367 = vtanh.f32 %v2037_v0 }
 0x624   : > { %v3368_v3 = vpop.eup %3367 }
 0x625   : > { %v2040_v11 = vmul.f32 %v3368_v3, %v2039_v12  ;;  %v2053_v12 = vld [vmem:[%s2050_s13 + $0x10] sm:$0xff] }
 0x627   : > { %v4707_v17 = vadd.f32 %v2041_v29, %v2040_v11 }
 0x629   : > { %2045 = vst [vmem:[%s2044_s18] sm:$0xff] %v4707_v17  ;;  %2167 = vmatmul.mubr.f32.vlgmr.msra.gmra.mxu0 %v4707_v17  ;;  %3197 = vmatmul.mubr.f32.vlgmr.msra.gmra.mxu1 %v4707_v17 }
 0x62a   : > { %2383 = vmatprep.mubr.f32.mxu0 %v4897_v5  ;;  %3231 = vmatprep.mubr.msk.f32.mxu1 %vm3591_vm1, %v4897_v5 }
 0x62b   : > { %2320 = vmatpush1.msra.mxu0 %v2316_v27  ;;  %3200 = vmatpush3.msra.mxu1 %v2318_v31 }
 0x62c   : > { %2321 = vmatprep.subr.mxu0 %v2314_v34  ;;  %3201 = vmatprep.subr.mxu1 %v4897_v5 }
 0x62d   : > { %2322 = vmatpush1.msra.mxu0 %v2313_v63  ;;  %3202 = vmatpush3.msra.mxu1 %v4490_v42  ;;  %v2302_v42 = vld [vmem:[%s3797_s23 + $0xf8] sm:$0xff] }
 0x62e   : > { %2323 = vmatprep.subr.mxu0 %v2311_v2  ;;  %3203 = vmatprep.subr.mxu1 %v4897_v5 }
 0x62f   : > { %2324 = vmatpush1.msra.mxu0 %v2310_v4  ;;  %3204 = vmatpush3.msra.mxu1 %v4495_v20  ;;  %v2301_v20 = vld [vmem:[%s3797_s23 + $0xf0] sm:$0xff]  ;;  %v2268_v4 = vld [vmem:[%s2267_s26] sm:$0xff] }
 0x630   : > { %2325 = vmatprep.subr.mxu0 %v2308_v7  ;;  %3205 = vmatprep.subr.mxu1 %v4897_v5 }
 0x631   : > { %2326 = vmatpush1.msra.mxu0 %v2307_v9  ;;  %3206 = vmatpush3.msra.mxu1 %v4500_v28  ;;  %v2298_v28 = vld [vmem:[%s3797_s23 + $0xd8] sm:$0xff] }
 0x632   : > { %2327 = vmatprep.subr.mxu0 %v2305_v10  ;;  %3207 = vmatprep.subr.mxu1 %v4897_v5 }
 0x633   : > { %2328 = vmatpush1.msra.mxu0 %v2304_v13  ;;  %3208 = vmatpush3.msra.mxu1 %v4505_v30  ;;  %v2297_v30 = vld [vmem:[%s3797_s23 + $0xd0] sm:$0xff] }
 0x634   : > { %2329 = vmatprep.subr.mxu0 %v2302_v42  ;;  %3209 = vmatprep.subr.mxu1 %v4897_v5 }
 0x635   : > { %2330 = vmatpush1.msra.mxu0 %v2301_v20  ;;  %3210 = vmatpush3.msra.mxu1 %v4510_v32  ;;  %v2290_v32 = vld [vmem:[%s3797_s23 + $0x98] sm:$0xff]  ;;  %s2774_s23 = sshll.u32 %s4780_s27, 3 }
 0x636   : > { %2331 = vmatprep.subr.mxu0 %v2299_v19  ;;  %3211 = vmatprep.subr.mxu1 %v4897_v5  ;;  %s2262_s25 = scalar_lea.vmem %s4150_s14, %s2774_s23 [#allocation12]  ;;  %v2269_v19 = vld [vmem:[%s2267_s26 + $0x8] sm:$0xff]  ;;  %s3496_s14 = sshll.u32 %s3592_s21, 4  ;;  %s3497_s14 = int_to_ptr.vmem [resolvable:$false] %s3496_s14 }
 0x637   : > { %2332 = vmatpush1.msra.mxu0 %v2298_v28  ;;  %3212 = vmatpush3.msra.mxu1 %v2300_v44  ;;  %s3498_s28 = scalar_lea.vmem %s3497_s14, 2048  ;;  %p3499_p1 = scmp.lt.s32.totalorder %s4798_s24, %s3497_s14 }
 0x638   : > { %2333 = vmatprep.subr.mxu0 %v2296_v14  ;;  %3213 = vmatprep.subr.mxu1 %v4897_v5  ;;  %p3500_p6 = scmp.lt.s32.totalorder %s3498_s28, %s3492_s15 }
 0x639   : > { %2334 = vmatpush1.msra.mxu0 %v2295_v15  ;;  %3214 = vmatpush3.msra.mxu1 %v2297_v30 }
 0x63a   : > { %2335 = vmatprep.subr.mxu0 %v2293_v21  ;;  %3215 = vmatprep.subr.mxu1 %v4897_v5  ;;  %p3501_p2 = por %p3500_p6, %p3499_p1 }
 0x63b   : > { %2336 = vmatpush1.msra.mxu0 %v2292_v38  ;;  %3216 = vmatpush3.msra.mxu1 %v2294_v40  ;;  %v2270_v38 = vld [vmem:[%s2267_s26 + $0x10] sm:$0xff] }
 0x63c   : > { %2337 = vmatprep.subr.mxu0 %v2290_v32  ;;  %3217 = vmatprep.subr.mxu1 %v4897_v5  ;;  %p3502_p9 = pnand %p3501_p2, %p3495_p10 }
 0x63d   : > { %2338 = vmatpush1.msra.mxu0 %v2289_v41  ;;  %3218 = vmatpush3.msra.mxu1 %v2291_v18 }
 0x63e   : > { %2339 = vmatprep.subr.mxu0 %v2287_v16  ;;  %3219 = vmatprep.subr.mxu1 %v4897_v5 }
 0x63f   : > { %2340 = vmatpush1.msra.mxu0 %v2286_v26  ;;  %3220 = vmatpush3.msra.mxu1 %v2288_v36 }
 0x640   : > { %2341 = vmatprep.subr.mxu0 %v2284_v23  ;;  %3221 = vmatprep.subr.mxu1 %v4897_v5 }
 0x641   : > { %2342 = vmatpush1.msra.mxu0 %v2283_v24  ;;  %3222 = vmatpush3.msra.mxu1 %v2285_v25 }
 0x642   : > { %2343 = vmatprep.subr.mxu0 %v2281_v33  ;;  %3223 = vmatprep.subr.mxu1 %v4897_v5 }
 0x643   : > { %2344 = vmatpush1.msra.mxu0 %v2280_v35  ;;  %3224 = vmatpush3.msra.mxu1 %v2282_v37 }
 0x644   : > { %2345 = vmatprep.subr.mxu0 %v2278_v6  ;;  %3225 = vmatprep.subr.mxu1 %v4897_v5 }
 0x645   : > { %2346 = vmatpush1.msra.mxu0 %v2277_v45  ;;  %3226 = vmatpush3.msra.mxu1 %v2279_v47 }
 0x646   : > { %2347 = vmatprep.subr.mxu0 %v2275_v48  ;;  %3227 = vmatprep.subr.mxu1 %v4897_v5 }
 0x647   : > { %2348 = vmatpush1.msra.mxu0 %v2274_v50  ;;  %3228 = vmatpush3.msra.mxu1 %v2276_v51 }
 0x648   : > { %2349 = vmatprep.subr.mxu0 %v2272_v53  ;;  %3229 = vmatprep.subr.mxu1 %v4897_v5 }
 0x649   : > { %2350 = vmatpush1.msra.mxu0 %v2271_v54  ;;  %3230 = vmatpush3.msra.mxu1 %v2273_v39 }
 0x6e9   : > { %v2168_v43 = vpop.f32.mrf.mxu0  ;;  %v2239_v56 = vpop.f32.mrf.mxu1 }
 0x6ea   : > { %v2243_v46 = vadd.f32 %v2168_v43, %v2051_v55  ;;  %v2253_v62 = vadd.f32 %v4701_v59, %v2239_v56 }
 0x6eb   : > { %v3198_v57 = vpop.f32.mrf.mxu1  ;;  %v2170_v58 = vpop.f32.mrf.mxu0 }
 0x6ec   : > { %v2244_v49 = vmul.f32 0.5, %v2243_v46  ;;  %v2248_v60 = vadd.f32 %v2170_v58, %v2052_v52 }
 0x6ee   : > { %3369 = vtanh.f32 %v2244_v49  ;;  %v2249_v5 = vmul.f32 0.5, %v2248_v60 }
 0x6f0   : > { %3371 = vtanh.f32 %v2249_v5 }
 0x6fb   : > { %v3370_v61 = vpop.eup %3369 }
 0x6fc   : > { %v2246_v0 = vadd.f32 1.0, %v3370_v61 }
 0x6fd   : > { %v3372_v29 = vpop.eup %3371 }
 0x6fe   : > { %v2247_v1 = vmul.f32 0.5, %v2246_v0  ;;  %v2251_v11 = vadd.f32 1.0, %v3372_v29 }
 0x700   : > { %v2254_v8 = vmul.f32 %v2253_v62, %v2247_v1  ;;  %v2252_v22 = vmul.f32 0.5, %v2251_v11 }
 0x702   : > { %v2255_v3 = vadd.f32 %v2254_v8, %v2053_v12  ;;  %v2257_v27 = vsub.f32 1.0, %v2252_v22  ;;  %v2259_v34 = vmul.f32 %v2252_v22, %v4707_v17 }
 0x704   : > { %3373 = vtanh.f32 %v2255_v3 }
 0x711   : > { %v3374_v31 = vpop.eup %3373 }
 0x712   : > { %v2258_v63 = vmul.f32 %v3374_v31, %v2257_v27 }
 0x714   : > { %v2260_v2 = vadd.f32 %v2259_v34, %v2258_v63 }
 0x716   : > { %2263 = vst [vmem:[%s2262_s25] sm:$0xff] %v2260_v2  ;;  %2384 = vmatmul.mubr.f32.vlgmr.msra.gmra.mxu0 %v2260_v2  ;;  %3232 = vmatmul.mubr.f32.vlgmr.msra.gmra.mxu1 %v2260_v2 }
 0x7d6   : > { %v2385_v7 = vpop.f32.mrf.mxu0  ;;  %v2456_v9 = vpop.f32.mrf.mxu1 }
 0x7d7   : > { %v2460_v10 = vadd.f32 %v2385_v7, %v2268_v4  ;;  %v2470_v30 = vadd.f32 %v4701_v59, %v2456_v9 }
 0x7d8   : > { %v3233_v13 = vpop.f32.mrf.mxu1  ;;  %v2387_v20 = vpop.f32.mrf.mxu0 }
 0x7d9   : > { %v2461_v42 = vmul.f32 0.5, %v2460_v10  ;;  %v2465_v28 = vadd.f32 %v2387_v20, %v2269_v19 }
 0x7db   : > { %3375 = vtanh.f32 %v2461_v42  ;;  %v2466_v17 = vmul.f32 0.5, %v2465_v28 }
 0x7dd   : > { %3377 = vtanh.f32 %v2466_v17 }
 0x7e8   : > { %v3376_v44 = vpop.eup %3375 }
 0x7e9   : > { %v2463_v14 = vadd.f32 1.0, %v3376_v44 }
 0x7ea   : > { %v3378_v32 = vpop.eup %3377 }
 0x7eb   : > { %v2464_v15 = vmul.f32 0.5, %v2463_v14  ;;  %v2468_v41 = vadd.f32 1.0, %v3378_v32 }
 0x7ed   : > { %v2471_v21 = vmul.f32 %v2470_v30, %v2464_v15  ;;  %v2469_v18 = vmul.f32 0.5, %v2468_v41 }
 0x7ef   : > { %v2472_v40 = vadd.f32 %v2471_v21, %v2270_v38  ;;  %v2474_v16 = vsub.f32 1.0, %v2469_v18  ;;  %v2476_v23 = vmul.f32 %v2469_v18, %v2260_v2 }
 0x7f1   : > { %3379 = vtanh.f32 %v2472_v40 }
 0x7fe   : > { %v3380_v26 = vpop.eup %3379 }
 0x7ff   : > { %v2475_v36 = vmul.f32 %v3380_v26, %v2474_v16 }
 0x801   : > { %v2477_v59 = vadd.f32 %v2476_v23, %v2475_v36 }
 0x803   : > { %2480 = vst [vmem:[%s2479_s30] sm:$0xff] %v2477_v59 }
 0x804   : > { %3505 = shalt.err (!%p3502_p9)
}
 0x805   : > { %s3506_s29 = scalar_lea.hbm %s4796_s9, 1024  ;;  %s3510_s27 = scalar_lea.hbm %s4851_s5, 2048 }
 0x806   : > { %p3507_p11 = scmp.ne.s32.totalorder %s4796_s9, %s3506_s29  ;;  %p3511_p12 = scmp.lt.s32.totalorder %s4796_s9, %s4851_s5 }
 0x807   : > { %p3512_p13 = scmp.lt.s32.totalorder %s3510_s27, %s3506_s29 }
 0x808   : > { %p3508_p3 = pnand %p3507_p11, %p4910_p4 }
 0x809   : > { %p3513_p8 = por %p3512_p13, %p3511_p12 }
 0x80a   : > { %p3509_p5 = pneg %p3508_p3 }
 0x80c   : > { %p3514_p0 = pnand %p3513_p8, %p3509_p5 }
 0x80e   : > { %3517 = shalt.err (!%p3514_p0)
}
 0x80f   : > { %s3593_s23 = smov 128   ;;  %s3594_s25 = smov 8  }
 0x810   : > { %3253 = dma.vmem_to_hbm [thread:$0]  (%p4910_p4), %s4798_s24, 1024, %s4796_s9, %s2483_s12, %s3593_s23, %s3593_s23, %s3594_s25  }
 0x811 PF: > { %s4911_s17 = sld [smem:[#allocation17_spill]] }
 0x812   : > { %s4912_s26 = sld [smem:[#allocation22_spill]] }
 0x813   : > { %s4913_s1 = sld [smem:[#allocation19_spill]] }
 0x817   : > { %s2518_s20 = sand.u32 1, %s4911_s17  }
 0x818   : > { %p4914_p7 = scmp.ne.s32.totalorder %s4912_s26, 0  ;;  %s2519_s30 = scalar_lea.sflag [#allocation6], %s2518_s20 }
 0x819   : > { %p4915_p10 = scmp.ge.s32.totalorder %s4913_s1, 2 }
 0x81b   : > { %p3269_p1 = pnand %p4915_p10, %p4914_p7 }
 0x81d   : > { %p3270_p6 = pneg %p3269_p1 }
 0x81f   : > { %3555 = dma.done.wait (%p3270_p6), %s2519_s30, 1024  }
 0x820   : > { %3557 = vsyncadd (%p3270_p6), %s2519_s30, 4294966272  ;;  %s27_s23 = sadd.s32 1, %s4913_s1   ;;  %s4916_s11 = sld [smem:[#allocation18_spill]] }
 0x821   : > { %p24_p2 = scmp.ge.s32.totalorder %s27_s23, 4   ;;  %s4917_s20 = sld [smem:[#allocation21_spill]] }
 0x822   : > { %s4918_s6 = sld [smem:[#allocation20_spill]]  ;;  %s4919_s18 = smov %s3564_s19 }
 0x823   : > { %s4921_s21 = smov %s3576_s22 }
 0x824   :  { %26 = sbr.rel (!%p24_p2) target bundleno = 12 (0xc), region = 145 }
 0x826   : > { %s4920_s19 = smov %s4916_s11 }
 0x828   : > { %s4922_s22 = smov %s4918_s6 }
 0x829   :  { %2524 = vsyncpa [#allocation5], 1 }
 0x82a   :  { %2526 = vsyncpa [#allocation5 + $0x1], 1 }
 0x82b   :  { %2527 = vsyncpa [#allocation8], 1 }
 0x82c   :  { %2529 = vsyncpa [#allocation8 + $0x1], 1 }
 0x82d   :  { %2530 = vsyncpa [#allocation11], 1 }
 0x82e   :  { %2532 = vsyncpa [#allocation11 + $0x1], 1 }
 0x82f   :  { %2533 = vsyncpa [#allocation6], 1 }
 0x830   :  { %2535 = vsyncpa [#allocation6 + $0x1], 1 }

</bundles_post_ra>
